<compile_context>
chip_gen: v6e
topology: v6e:2x2x1
jax: 0.10.0
libtpu: 0.0.40
codegen_flags: <defaults>
</compile_context>

<pallas_src>
import functools

import jax
import jax.numpy as jnp
from jax.experimental import pallas as pl
from jax.experimental.pallas import tpu as pltpu


def _round_up(v, m):
    return ((v + m - 1) // m) * m


def _is_multi_tensorcore_chip():
    """True only for chips with >1 TensorCore (v7x). Best effort, never raises."""
    try:
        kind = jax.devices()[0].device_kind.lower()
        return ("v7" in kind) or ("7x" in kind)
    except Exception:
        return False


def _vmem_limit_bytes():
    """Half the physical VMEM (>= the scoped default on all generations)."""
    try:
        cap = int(pltpu.get_tpu_info().vmem_capacity_bytes)
        return min(cap // 2, 64 * 1024 * 1024)
    except Exception:
        return 32 * 1024 * 1024


def _gated_attn_kernel(x_ref, wab_ref, bab_ref, wc_ref, bc_ref, a_out_ref,
                       *, dp, reduce_c):
    # One tile of rows.  x arrives in its HBM dtype; cast to bf16 only for the
    # MXU push (accumulation stays f32 via preferred_element_type).
    x = x_ref[...].astype(jnp.bfloat16)
    # Single fused gate projection -> (tm, 2*dp) f32.
    h = jnp.dot(x, wab_ref[...], preferred_element_type=jnp.float32)
    h = h + bab_ref[...]
    a = jnp.tanh(h[:, :dp])            # dp is a multiple of 128: lane-aligned split
    b = jax.nn.sigmoid(h[:, dp:])
    gated = a * b                      # (tm, dp) f32

    if reduce_c:
        # n_classes == 1: wc_ref is a (1, dp) f32 row.  A 1-column MXU matmul
        # would waste 255/256 output columns; VPU multiply + XLU cross-lane
        # reduce is cheaper and skips an MXU drain.
        A = jnp.sum(gated * wc_ref[...], axis=-1, keepdims=True) + bc_ref[...]
    else:
        # Tiny (dp, C) projection; keep it in f32 (precision is cheap here).
        A = jnp.dot(gated, wc_ref[...], preferred_element_type=jnp.float32)
        A = A + bc_ref[...]
    a_out_ref[...] = A.astype(a_out_ref.dtype)


def prepare_params(params):
    """One-time parameter prep: pad D to 128, fuse [Wa|Wb], cast dtypes.

    Call this once (outside the per-bag loop) and reuse the result.
    """
    wa, ba, wb, bb, wc, bc = params
    L, D = wa.shape
    C = wc.shape[1]
    dp = _round_up(D, 128)
    if dp != D:
        colpad = ((0, 0), (0, dp - D))
        wa = jnp.pad(wa, colpad)
        wb = jnp.pad(wb, colpad)
        ba = jnp.pad(ba, colpad)
        bb = jnp.pad(bb, colpad)
        wc = jnp.pad(wc, ((0, dp - D), (0, 0)))
    wab = jnp.concatenate([wa, wb], axis=1).astype(jnp.bfloat16)   # (L, 2*dp)
    bab = jnp.concatenate([ba, bb], axis=1).astype(jnp.float32)    # (1, 2*dp)
    if C == 1:
        wc_arg = wc.reshape(1, dp).astype(jnp.float32)   # row for VPU+XLU reduce
    else:
        wc_arg = wc.astype(jnp.float32)                  # (dp, C) for the MXU
    return (wab, bab, wc_arg, bc.astype(jnp.float32))


def attn_net_gated_forward(x, prepared, *, tm=None):
    """Gated attention forward. `prepared` comes from prepare_params().

    Returns (A, x) like the PyTorch module (eval mode; dropout = identity).
    """
    wab, bab, wc, bc = prepared
    N, L = x.shape
    two_dp = wab.shape[1]
    dp = two_dp // 2
    C = bc.shape[1]
    reduce_c = (C == 1)

    # Row tile: target ~2 MiB of x per grid step, multiple of 8, clamped to
    # [256, 1024] and to the (rounded-up) number of rows.
    if tm is None:
        bytes_per_row = max(1, L * x.dtype.itemsize)
        tm = max(256, (2 * 1024 * 1024) // bytes_per_row)
    tm = max(8, min(int(tm), 1024))
    tm = min(tm, _round_up(N, 8))
    tm = max(8, (tm // 8) * 8)

    # v7x only: keep the number of tiles even so the 2 TensorCores sharing the
    # "parallel" grid axis get balanced work.  Single-TC chips keep the
    # biggest tile (fewer grid steps = less pipeline overhead).
    if _is_multi_tensorcore_chip():
        n_tiles = pl.cdiv(N, tm)
        if n_tiles % 2 == 1 and N > 8:
            tm = max(8, _round_up(pl.cdiv(N, n_tiles + 1), 8))

    n_tiles = pl.cdiv(N, tm)

    kernel = functools.partial(_gated_attn_kernel, dp=dp, reduce_c=reduce_c)
    wc_block = (1, dp) if reduce_c else (dp, C)

    A = pl.pallas_call(
        kernel,
        out_shape=jax.ShapeDtypeStruct((N, C), jnp.float32),
        grid_spec=pltpu.PrefetchScalarGridSpec(
            num_scalar_prefetch=0,
            grid=(n_tiles,),
            in_specs=[
                pl.BlockSpec((tm, L), lambda i: (i, 0)),        # x tile (HBM dtype)
                pl.BlockSpec((L, two_dp), lambda i: (0, 0)),    # fused gate W (resident)
                pl.BlockSpec((1, two_dp), lambda i: (0, 0)),    # fused gate bias
                pl.BlockSpec(wc_block, lambda i: (0, 0)),       # Wc (row or matrix)
                pl.BlockSpec((1, C), lambda i: (0, 0)),         # bc
            ],
            out_specs=pl.BlockSpec((tm, C), lambda i: (i, 0)),
        ),
        compiler_params=pltpu.CompilerParams(
            dimension_semantics=("parallel",),
            vmem_limit_bytes=_vmem_limit_bytes()),
    )(x, wab, bab, wc, bc)

    return A, x


def init_params(key, L, D, n_classes):
    """Deterministic parameter init matching the nn.Linear shapes.

    PyTorch Linear(L, D) has weight (D, L); we store the transpose (L, D) so
    the kernel computes x @ W directly.
    """
    ks = jax.random.split(key, 6)
    sa = 1.0 / jnp.sqrt(L)
    sc = 1.0 / jnp.sqrt(D)
    wa = jax.random.uniform(ks[0], (L, D), jnp.float32, -sa, sa)
    ba = jax.random.uniform(ks[1], (1, D), jnp.float32, -sa, sa)
    wb = jax.random.uniform(ks[2], (L, D), jnp.float32, -sa, sa)
    bb = jax.random.uniform(ks[3], (1, D), jnp.float32, -sa, sa)
    wc = jax.random.uniform(ks[4], (D, n_classes), jnp.float32, -sc, sc)
    bc = jax.random.uniform(ks[5], (1, n_classes), jnp.float32, -sc, sc)
    return (wa, ba, wb, bb, wc, bc)


def _reference_f32(x, params):
    wa, ba, wb, bb, wc, bc = params
    a = jnp.tanh(x @ wa + ba)
    b = jax.nn.sigmoid(x @ wb + bb)
    return (a * b) @ wc + bc


def _reference_bf16_inputs(x, params):
    """Same math, but with the same bf16-cast gate operands the kernel sees
    (final projection stays f32, matching the kernel)."""
    wa, ba, wb, bb, wc, bc = params
    xq = x.astype(jnp.bfloat16).astype(jnp.float32)
    waq = wa.astype(jnp.bfloat16).astype(jnp.float32)
    wbq = wb.astype(jnp.bfloat16).astype(jnp.float32)
    a = jnp.tanh(xq @ waq + ba)
    b = jax.nn.sigmoid(xq @ wbq + bb)
    return (a * b) @ wc + bc


if __name__ == "__main__":

    def run_case(key, N, L, D, n_classes, tm=None):
        k_x, k_p = jax.random.split(key)
        x = jax.random.normal(k_x, (N, L), jnp.float32)
        params = init_params(k_p, L, D, n_classes)
        prepared = prepare_params(params)      # one-time prep (fused/cast weights)
        fwd = jax.jit(functools.partial(attn_net_gated_forward, tm=tm))
        A, x_out = fwd(x, prepared)
        jax.block_until_ready((A, x_out))

        assert A.shape == (N, n_classes)
        assert x_out.shape == x.shape
        # Tight check vs. a reference using the same bf16-cast gate operands.
        A_ref_q = _reference_bf16_inputs(x, params)
        assert jnp.allclose(A, A_ref_q, atol=2e-3, rtol=2e-3), (
            "max abs diff vs quantized ref: %f" % float(jnp.max(jnp.abs(A - A_ref_q))))
        # Loose semantic check vs. the full-f32 module math.
        A_ref = _reference_f32(x, params)
        assert jnp.allclose(A, A_ref, atol=5e-2, rtol=5e-2)
        assert jnp.allclose(x_out, x)

    key = jax.random.PRNGKey(0)
    k1, k2 = jax.random.split(key)

    # Case 1 (module-default head, scaled down): n_classes == 1, D not a
    # multiple of 128 (exercises the pad path), N not a multiple of the tile
    # (exercises partial edge blocks without any wrapper padding).
    run_case(k1, N=300, L=256, D=192, n_classes=1)

    # Case 2: n_classes > 1 -> f32 MXU final projection path, lane-aligned D.
    run_case(k2, N=200, L=128, D=128, n_classes=3)

    print("KERNEL_OK")
</pallas_src>

<mosaic_0001>
module attributes {stable_mosaic.version = 11 : i64} {
  func.func @_gated_attn_kernel(%arg0: i32, %arg1: memref<304x256xf32, #tpu.memory_space<vmem>>, %arg2: memref<256x512xbf16, #tpu.memory_space<vmem>>, %arg3: memref<1x512xf32, #tpu.memory_space<vmem>>, %arg4: memref<1x256xf32, #tpu.memory_space<vmem>>, %arg5: memref<1x1xf32, #tpu.memory_space<vmem>>, %arg6: memref<304x1xf32, #tpu.memory_space<vmem>>) attributes {dimension_semantics = [#tpu.dimension_semantics<parallel>], iteration_bounds = array<i64: 1>, scalar_prefetch = 0 : i64, scratch_operands = 0 : i64, tpu.core_type = #tpu.core_type<tc>, window_params = [{transform_indices = @transform_0, window_bounds = array<i64: 304, 256>}, {pipeline_mode = #tpu.pipeline_mode<synchronous>, transform_indices = @transform_1, window_bounds = array<i64: 256, 512>}, {pipeline_mode = #tpu.pipeline_mode<synchronous>, transform_indices = @transform_2, window_bounds = array<i64: 1, 512>}, {pipeline_mode = #tpu.pipeline_mode<synchronous>, transform_indices = @transform_3, window_bounds = array<i64: 1, 256>}, {pipeline_mode = #tpu.pipeline_mode<synchronous>, transform_indices = @transform_4, window_bounds = array<i64: 1, 1>}, {transform_indices = @transform_5, window_bounds = array<i64: 304, 1>}]} {
    %c0 = arith.constant 0 : index
    %c0_0 = arith.constant 0 : index
    %0 = vector.load %arg1[%c0, %c0_0] : memref<304x256xf32, #tpu.memory_space<vmem>>, vector<304x256xf32>
    %1 = arith.truncf %0 : vector<304x256xf32> to vector<304x256xbf16>
    %c0_1 = arith.constant 0 : index
    %c0_2 = arith.constant 0 : index
    %2 = vector.load %arg2[%c0_1, %c0_2] : memref<256x512xbf16, #tpu.memory_space<vmem>>, vector<256x512xbf16>
    %cst = arith.constant dense<0.000000e+00> : vector<304x512xf32>
    %3 = tpu.matmul %1, %2, %cst {dimension_numbers = #tpu.dot_dimension_numbers<[1], [0], [0], [1], [0, 0, 1, 1], [], []>} : vector<304x256xbf16>, vector<256x512xbf16>, vector<304x512xf32> -> vector<304x512xf32>
    %c0_3 = arith.constant 0 : index
    %c0_4 = arith.constant 0 : index
    %4 = vector.load %arg3[%c0_3, %c0_4] : memref<1x512xf32, #tpu.memory_space<vmem>>, vector<1x512xf32>
    %5 = vector.broadcast %4 : vector<1x512xf32> to vector<304x512xf32>
    %6 = arith.addf %3, %5 : vector<304x512xf32>
    %7 = vector.extract_strided_slice %6 {offsets = [0, 0], sizes = [304, 256], strides = [1, 1]} : vector<304x512xf32> to vector<304x256xf32>
    %8 = math.tanh %7 : vector<304x256xf32>
    %9 = vector.extract_strided_slice %6 {offsets = [0, 256], sizes = [304, 256], strides = [1, 1]} : vector<304x512xf32> to vector<304x256xf32>
    %10 = arith.negf %9 : vector<304x256xf32>
    %11 = math.exp %10 : vector<304x256xf32>
    %cst_5 = arith.constant 1.000000e+00 : f32
    %12 = vector.broadcast %cst_5 : f32 to vector<304x256xf32>
    %13 = arith.addf %12, %11 : vector<304x256xf32>
    %14 = arith.divf %12, %13 : vector<304x256xf32>
    %15 = arith.mulf %8, %14 : vector<304x256xf32>
    %c0_6 = arith.constant 0 : index
    %c0_7 = arith.constant 0 : index
    %16 = vector.load %arg4[%c0_6, %c0_7] : memref<1x256xf32, #tpu.memory_space<vmem>>, vector<1x256xf32>
    %17 = vector.broadcast %16 : vector<1x256xf32> to vector<304x256xf32>
    %18 = arith.mulf %15, %17 : vector<304x256xf32>
    %cst_8 = arith.constant dense<0.000000e+00> : vector<304xf32>
    %19 = vector.multi_reduction <add>, %18, %cst_8 [1] : vector<304x256xf32> to vector<304xf32>
    %20 = vector.shape_cast %19 : vector<304xf32> to vector<304x1xf32>
    %c0_9 = arith.constant 0 : index
    %c0_10 = arith.constant 0 : index
    %21 = vector.load %arg5[%c0_9, %c0_10] : memref<1x1xf32, #tpu.memory_space<vmem>>, vector<1x1xf32>
    %22 = vector.broadcast %21 : vector<1x1xf32> to vector<304x1xf32>
    %23 = arith.addf %20, %22 : vector<304x1xf32>
    %c0_11 = arith.constant 0 : index
    %c0_12 = arith.constant 0 : index
    %24 = vector.load %arg6[%c0_11, %c0_12] : memref<304x1xf32, #tpu.memory_space<vmem>>, vector<304x1xf32>
    tpu.vector_store %arg6[%c0_11, %c0_12], %23 {strides = array<i32>} : memref<304x1xf32, #tpu.memory_space<vmem>>, vector<304x1xf32>,
    return
  }
  func.func @transform_0(%arg0: i32) -> (i32, i32) {
    %c0_i32 = arith.constant 0 : i32
    %c0_i32_0 = arith.constant 0 : i32
    return %arg0, %c0_i32 : i32, i32
  }
  func.func @transform_1(%arg0: i32) -> (i32, i32) {
    %c0_i32 = arith.constant 0 : i32
    %c0_i32_0 = arith.constant 0 : i32
    %c0_i32_1 = arith.constant 0 : i32
    return %c0_i32, %c0_i32_0 : i32, i32
  }
  func.func @transform_2(%arg0: i32) -> (i32, i32) {
    %c0_i32 = arith.constant 0 : i32
    %c0_i32_0 = arith.constant 0 : i32
    %c0_i32_1 = arith.constant 0 : i32
    return %c0_i32, %c0_i32_0 : i32, i32
  }
  func.func @transform_3(%arg0: i32) -> (i32, i32) {
    %c0_i32 = arith.constant 0 : i32
    %c0_i32_0 = arith.constant 0 : i32
    %c0_i32_1 = arith.constant 0 : i32
    return %c0_i32, %c0_i32_0 : i32, i32
  }
  func.func @transform_4(%arg0: i32) -> (i32, i32) {
    %c0_i32 = arith.constant 0 : i32
    %c0_i32_0 = arith.constant 0 : i32
    %c0_i32_1 = arith.constant 0 : i32
    return %c0_i32, %c0_i32_0 : i32, i32
  }
  func.func @transform_5(%arg0: i32) -> (i32, i32) {
    %c0_i32 = arith.constant 0 : i32
    %c0_i32_0 = arith.constant 0 : i32
    return %arg0, %c0_i32 : i32, i32
  }
}

</mosaic_0001>

<bundles_post_ra>
// kernel: attn_net_gated_forward.1
= control target key start
LH: loop header
LB: loop body
LE: loop exit
PB: predicated region body
PF: predicated region fallthrough
CT: control target
= control target key end

     0   :  { %s3506_s0 = inlined_call_operand.hbm [shape: f32[300,256], index: 0, kind: input, shape index: {}]   ;;  %s3507_s1 = inlined_call_operand.hbm [shape: bf16[256,512], index: 1, kind: input, shape index: {}]   ;;  %s3508_s2 = inlined_call_operand.hbm [shape: f32[1,512], index: 2, kind: input, shape index: {}]   ;;  %s3509_s3 = inlined_call_operand.vmem [shape: f32[1,256], index: 3, kind: input, shape index: {}]   ;;  %s3510_s4 = inlined_call_operand.<no memory space> [shape: f32[1,1], index: 4, kind: input, shape index: {}]   ;;  %s3511_s5 = inlined_call_operand.vmem [shape: f32[300,1], index: 5, kind: output, shape index: {}]  }
   0x1   :  { %v10_v0 = vstv %s3510_s4 }
   0x2   :  { %11 = vst [vmem:[#allocation2] sm:$0x1] %v10_v0 }
   0x3   :  { %12 = vsyncpa [#allocation4], 0 }
   0x4   :  { %13 = vsyncpa [#allocation6], 0  ;;  %s2689_s20 = smov [#allocation5]   ;;  %s2690_s22 = smov [#allocation3]  }
   0x5   :  { %s31_s21 = sshll.u32 %s2689_s20, 4  ;;  %s19_s23 = sshll.u32 %s2690_s22, 4  ;;  %s32_s21 = int_to_ptr.vmem [resolvable:$true] %s31_s21  ;;  %s20_s23 = int_to_ptr.vmem [resolvable:$true] %s19_s23 }
   0x6   :  { %s2633_s24 = scalar_lea.vmem %s32_s21, 8192  ;;  %p2638_p1 = scmp.lt.s32.totalorder %s32_s21, %s32_s21 }
   0x7   :  { %p2634_p0 = scmp.ne.s32.totalorder %s32_s21, %s2633_s24  ;;  %p2639_p2 = scmp.lt.s32.totalorder %s2633_s24, %s2633_s24 }
   0x9   :  { %p2640_p3 = por %p2639_p2, %p2638_p1 }
   0xb   :  { %p2641_p4 = pnand %p2640_p3, %p2634_p0 }
   0xd   :  { %2644 = shalt.err (!%p2641_p4)
}
   0xe   :  { %s2691_s25 = smov 256   ;;  %s2692_s26 = smov 16  }
   0xf   :  { %37 = dma.hbm_to_vmem [thread:$0]  %s3507_s1, 8192, %s32_s21, [#allocation6], %s2691_s25, %s2691_s25, %s2692_s26  }
  0x10   :  { %s2653_s28 = scalar_lea.vmem %s20_s23, 9728  ;;  %p2658_p6 = scmp.lt.s32.totalorder %s20_s23, %s20_s23 }
  0x11   :  { %p2654_p5 = scmp.ne.s32.totalorder %s20_s23, %s2653_s28  ;;  %p2659_p7 = scmp.lt.s32.totalorder %s2653_s28, %s2653_s28 }
  0x13   :  { %p2660_p8 = por %p2659_p7, %p2658_p6 }
  0x15   :  { %p2661_p9 = pnand %p2660_p8, %p2654_p5 }
  0x17   :  { %2664 = shalt.err (!%p2661_p9)
}
  0x18   :  { %25 = dma.hbm_to_vmem [thread:$0]  %s3506_s0, 9728, %s20_s23, [#allocation4], %s2691_s25, %s2691_s25, %s2692_s26  }
  0x19   :  { %s2693_s6 = smov [#allocation7]  }
  0x1a   :  { %s44_s7 = sshll.u32 %s2693_s6, 4  ;;  %s45_s7 = int_to_ptr.vmem [resolvable:$true] %s44_s7 }
  0x1b   :  { %s2673_s8 = scalar_lea.vmem %s45_s7, 64  ;;  %p2678_p11 = scmp.lt.s32.totalorder %s45_s7, %s45_s7 }
  0x1c   :  { %p2674_p10 = scmp.ne.s32.totalorder %s45_s7, %s2673_s8  ;;  %p2679_p12 = scmp.lt.s32.totalorder %s2673_s8, %s2673_s8 }
  0x1e   :  { %p2680_p13 = por %p2679_p12, %p2678_p11 }
  0x20   :  { %p2681_p0 = pnand %p2680_p13, %p2674_p10 }
  0x22   :  { %2684 = shalt.err (!%p2681_p0)
}
  0x23   :  { %47 = dma.hbm_to_vmem [thread:$0]  %s3508_s2, 64, %s45_s7, [#allocation6]  }
  0x24   :  { %2685 = dma.done.wait [#allocation4], 9728  }
  0x25   :  { %2686 = vsyncadd [#allocation4], 4294957568 }
  0x26   :  { %2687 = dma.done.wait [#allocation6], 8256  }
  0x27   :  { %2688 = vsyncadd [#allocation6], 4294959040  ;;  %v2073_v1 = vld [vmem:[#allocation5 + $0xec] ss:$16 sps:$4 sm:$0xff]   ;;  %v2075_v2 = vld [vmem:[#allocation5 + $0xe8] ss:$16 sps:$4 sm:$0xff]  }
  0x28   :  { %804 = vmatprep.subr.bf16.mxu1 %v2073_v1  ;;  %v2076_v3 = vld [vmem:[#allocation5 + $0xcc] ss:$16 sps:$4 sm:$0xff]   ;;  %v2078_v4 = vld [vmem:[#allocation5 + $0xc8] ss:$16 sps:$4 sm:$0xff]   ;;  %v2082_v6 = vld [vmem:[#allocation5 + $0xe4] ss:$16 sps:$4 sm:$0xff]  }
  0x29   :  { %805 = vmatpush1.bf16.msra.mxu1 %v2075_v2  ;;  %v2079_v5 = vld [vmem:[#allocation5 + $0xac] ss:$16 sps:$4 sm:$0xff]   ;;  %v2081_v7 = vld [vmem:[#allocation5 + $0xa8] ss:$16 sps:$4 sm:$0xff]   ;;  %581 = vmatprep.subr.bf16.mxu0 %v2082_v6  ;;  %v2086_v8 = vld [vmem:[#allocation5 + $0xe0] ss:$16 sps:$4 sm:$0xff]  }
  0x2a   :  { %806 = vmatprep.subr.bf16.mxu1 %v2076_v3  ;;  %v2088_v9 = vld [vmem:[#allocation5 + $0xc4] ss:$16 sps:$4 sm:$0xff]   ;;  %v2084_v10 = vld [vmem:[#allocation5 + $0x8c] ss:$16 sps:$4 sm:$0xff]   ;;  %582 = vmatpush1.bf16.msra.mxu0 %v2086_v8  ;;  %v2092_v11 = vld [vmem:[#allocation5 + $0xc0] ss:$16 sps:$4 sm:$0xff]  }
  0x2b   :  { %583 = vmatprep.subr.bf16.mxu0 %v2088_v9  ;;  %v2094_v12 = vld [vmem:[#allocation5 + $0xa4] ss:$16 sps:$4 sm:$0xff]   ;;  %v2087_v13 = vld [vmem:[#allocation5 + $0x88] ss:$16 sps:$4 sm:$0xff]   ;;  %v2090_v14 = vld [vmem:[#allocation5 + $0x6c] ss:$16 sps:$4 sm:$0xff]  }
  0x2c   :  { %v2098_v15 = vld [vmem:[#allocation5 + $0xa0] ss:$16 sps:$4 sm:$0xff]   ;;  %v2100_v16 = vld [vmem:[#allocation5 + $0x84] ss:$16 sps:$4 sm:$0xff]   ;;  %v2093_v17 = vld [vmem:[#allocation5 + $0x68] ss:$16 sps:$4 sm:$0xff]  }
  0x2d   :  { %807 = vmatpush1.bf16.msra.mxu1 %v2078_v4  ;;  %v2096_v18 = vld [vmem:[#allocation5 + $0x4c] ss:$16 sps:$4 sm:$0xff]   ;;  %v2104_v19 = vld [vmem:[#allocation5 + $0x80] ss:$16 sps:$4 sm:$0xff]   ;;  %v2106_v20 = vld [vmem:[#allocation5 + $0x64] ss:$16 sps:$4 sm:$0xff]  }
  0x2e   :  { %808 = vmatprep.subr.bf16.mxu1 %v2079_v5  ;;  %584 = vmatpush1.bf16.msra.mxu0 %v2092_v11  ;;  %v2099_v21 = vld [vmem:[#allocation5 + $0x48] ss:$16 sps:$4 sm:$0xff]   ;;  %v2102_v22 = vld [vmem:[#allocation5 + $0x2c] ss:$16 sps:$4 sm:$0xff]   ;;  %v2110_v23 = vld [vmem:[#allocation5 + $0x60] ss:$16 sps:$4 sm:$0xff]  }
  0x2f   :  { %585 = vmatprep.subr.bf16.mxu0 %v2094_v12  ;;  %v2112_v24 = vld [vmem:[#allocation5 + $0x44] ss:$16 sps:$4 sm:$0xff]   ;;  %v2105_v25 = vld [vmem:[#allocation5 + $0x28] ss:$16 sps:$4 sm:$0xff]   ;;  %v2108_v26 = vld [vmem:[#allocation5 + $0xc] ss:$16 sps:$4 sm:$0xff]  }
  0x30   :  { %v2116_v27 = vld [vmem:[#allocation5 + $0x40] ss:$16 sps:$4 sm:$0xff]   ;;  %v2118_v28 = vld [vmem:[#allocation5 + $0x24] ss:$16 sps:$4 sm:$0xff]   ;;  %v2111_v29 = vld [vmem:[#allocation5 + $0x8] ss:$16 sps:$4 sm:$0xff]  }
  0x31   :  { %809 = vmatpush1.bf16.msra.mxu1 %v2081_v7  ;;  %v2114_v30 = vld [vmem:[#allocation5 + $0x1ec] ss:$16 sps:$4 sm:$0xff]   ;;  %v2122_v31 = vld [vmem:[#allocation5 + $0x20] ss:$16 sps:$4 sm:$0xff]   ;;  %v2124_v32 = vld [vmem:[#allocation5 + $0x4] ss:$16 sps:$4 sm:$0xff]  }
  0x32   :  { %810 = vmatprep.subr.bf16.mxu1 %v2084_v10  ;;  %586 = vmatpush1.bf16.msra.mxu0 %v2098_v15  ;;  %v2117_v33 = vld [vmem:[#allocation5 + $0x1e8] ss:$16 sps:$4 sm:$0xff]   ;;  %v2120_v34 = vld [vmem:[#allocation5 + $0x1cc] ss:$16 sps:$4 sm:$0xff]   ;;  %v2128_v35 = vld [vmem:[#allocation5] ss:$16 sps:$4 sm:$0xff]  }
  0x33   :  { %587 = vmatprep.subr.bf16.mxu0 %v2100_v16  ;;  %v2130_v36 = vld [vmem:[#allocation5 + $0x1e4] ss:$16 sps:$4 sm:$0xff]   ;;  %v2123_v37 = vld [vmem:[#allocation5 + $0x1c8] ss:$16 sps:$4 sm:$0xff]   ;;  %v2126_v38 = vld [vmem:[#allocation5 + $0x1ac] ss:$16 sps:$4 sm:$0xff]  }
  0x34   :  { %v2134_v39 = vld [vmem:[#allocation5 + $0x1e0] ss:$16 sps:$4 sm:$0xff]   ;;  %v2136_v40 = vld [vmem:[#allocation5 + $0x1c4] ss:$16 sps:$4 sm:$0xff]   ;;  %v2129_v41 = vld [vmem:[#allocation5 + $0x1a8] ss:$16 sps:$4 sm:$0xff]  }
  0x35   :  { %811 = vmatpush1.bf16.msra.mxu1 %v2087_v13  ;;  %v62_v42 = vld [vmem:[#allocation3 + $0x8] sm:$0xff]  ;;  %v64_v43 = vld [vmem:[#allocation3 + $0x18] sm:$0xff]  ;;  %v2140_v45 = vld [vmem:[#allocation5 + $0x1c0] ss:$16 sps:$4 sm:$0xff]   ;;  %vm1882_vm0 = vcmask 7168  }
  0x36   :  { %812 = vmatprep.subr.bf16.mxu1 %v2090_v14  ;;  %588 = vmatpush1.bf16.msra.mxu0 %v2104_v19  ;;  %v2132_v44 = vld [vmem:[#allocation5 + $0x18c] ss:$16 sps:$4 sm:$0xff]   ;;  %v138_v46 = vpack.c.bf16 %v64_v43, %v62_v42  ;;  %v2142_v47 = vld [vmem:[#allocation5 + $0x1a4] ss:$16 sps:$4 sm:$0xff]   ;;  %v2135_v48 = vld [vmem:[#allocation5 + $0x188] ss:$16 sps:$4 sm:$0xff]  }
  0x37   :  { %589 = vmatprep.subr.bf16.mxu0 %v2106_v20  ;;  %v2138_v49 = vld [vmem:[#allocation5 + $0x16c] ss:$16 sps:$4 sm:$0xff]   ;;  %v2146_v50 = vld [vmem:[#allocation5 + $0x1a0] ss:$16 sps:$4 sm:$0xff]   ;;  %v2148_v51 = vld [vmem:[#allocation5 + $0x184] ss:$16 sps:$4 sm:$0xff]  }
  0x38   :  { %836 = vmatprep.mubr.bf16.mxu1 %v138_v46  ;;  %613 = vmatprep.mubr.bf16.mxu0 %v138_v46  ;;  %v2141_v52 = vld [vmem:[#allocation5 + $0x168] ss:$16 sps:$4 sm:$0xff]   ;;  %v2144_v53 = vld [vmem:[#allocation5 + $0x14c] ss:$16 sps:$4 sm:$0xff]   ;;  %v2152_v54 = vld [vmem:[#allocation5 + $0x180] ss:$16 sps:$4 sm:$0xff]  }
  0x39   :  { %813 = vmatpush1.bf16.msra.mxu1 %v2093_v17  ;;  %v2154_v55 = vld [vmem:[#allocation5 + $0x164] ss:$16 sps:$4 sm:$0xff]   ;;  %v2147_v56 = vld [vmem:[#allocation5 + $0x148] ss:$16 sps:$4 sm:$0xff]   ;;  %v2150_v57 = vld [vmem:[#allocation5 + $0x12c] ss:$16 sps:$4 sm:$0xff]  }
  0x3a   :  { %814 = vmatprep.subr.bf16.mxu1 %v2096_v18  ;;  %590 = vmatpush1.bf16.msra.mxu0 %v2110_v23  ;;  %v2158_v58 = vld [vmem:[#allocation5 + $0x160] ss:$16 sps:$4 sm:$0xff]   ;;  %v2160_v59 = vld [vmem:[#allocation5 + $0x144] ss:$16 sps:$4 sm:$0xff]   ;;  %v2153_v60 = vld [vmem:[#allocation5 + $0x128] ss:$16 sps:$4 sm:$0xff]  }
  0x3b   :  { %591 = vmatprep.subr.bf16.mxu0 %v2112_v24  ;;  %v2156_v61 = vld [vmem:[#allocation5 + $0x10c] ss:$16 sps:$4 sm:$0xff]   ;;  %v2162_v62 = vld [vmem:[#allocation5 + $0x140] ss:$16 sps:$4 sm:$0xff]   ;;  %v2163_v63 = vld [vmem:[#allocation5 + $0x124] ss:$16 sps:$4 sm:$0xff]  }
  0x3c   :  { %v2159_v0 = vld [vmem:[#allocation5 + $0x108] ss:$16 sps:$4 sm:$0xff]   ;;  %v61_v1 = vld [vmem:[#allocation3] sm:$0xff]  ;;  %v63_v2 = vld [vmem:[#allocation3 + $0x10] sm:$0xff] }
  0x3d   :  { %815 = vmatpush1.bf16.msra.mxu1 %v2099_v21  ;;  %v2165_v3 = vld [vmem:[#allocation5 + $0x120] ss:$16 sps:$4 sm:$0xff]   ;;  %v66_v4 = vld [vmem:[#allocation3 + $0x28] sm:$0xff]  ;;  %v68_v5 = vld [vmem:[#allocation3 + $0x38] sm:$0xff]  ;;  %v137_v7 = vpack.c.bf16 %v63_v2, %v61_v1 }
  0x3e   :  { %816 = vmatprep.subr.bf16.mxu1 %v2102_v22  ;;  %592 = vmatpush1.bf16.msra.mxu0 %v2116_v27  ;;  %v2166_v6 = vld [vmem:[#allocation5 + $0x104] ss:$16 sps:$4 sm:$0xff]   ;;  %v140_v8 = vpack.c.bf16 %v68_v5, %v66_v4  ;;  %v2168_v9 = vld [vmem:[#allocation5 + $0x100] ss:$16 sps:$4 sm:$0xff]   ;;  %v70_v12 = vld [vmem:[#allocation3 + $0x48] sm:$0xff] }
  0x3f   :  { %593 = vmatprep.subr.bf16.mxu0 %v2118_v28  ;;  %v65_v10 = vld [vmem:[#allocation3 + $0x20] sm:$0xff]  ;;  %v67_v11 = vld [vmem:[#allocation3 + $0x30] sm:$0xff]  ;;  %v72_v13 = vld [vmem:[#allocation3 + $0x58] sm:$0xff] }
  0x40   :  { %v139_v14 = vpack.c.bf16 %v67_v11, %v65_v10  ;;  %v142_v15 = vpack.c.bf16 %v72_v13, %v70_v12  ;;  %v69_v16 = vld [vmem:[#allocation3 + $0x40] sm:$0xff]  ;;  %v71_v17 = vld [vmem:[#allocation3 + $0x50] sm:$0xff]  ;;  %v74_v18 = vld [vmem:[#allocation3 + $0x68] sm:$0xff] }
  0x41   :  { %817 = vmatpush1.bf16.msra.mxu1 %v2105_v25  ;;  %v76_v19 = vld [vmem:[#allocation3 + $0x78] sm:$0xff]  ;;  %v141_v20 = vpack.c.bf16 %v71_v17, %v69_v16  ;;  %v73_v22 = vld [vmem:[#allocation3 + $0x60] sm:$0xff]  ;;  %v75_v23 = vld [vmem:[#allocation3 + $0x70] sm:$0xff] }
  0x42   :  { %818 = vmatprep.subr.bf16.mxu1 %v2108_v26  ;;  %594 = vmatpush1.bf16.msra.mxu0 %v2122_v31  ;;  %v144_v21 = vpack.c.bf16 %v76_v19, %v74_v18  ;;  %v78_v24 = vld [vmem:[#allocation3 + $0x88] sm:$0xff]  ;;  %v80_v25 = vld [vmem:[#allocation3 + $0x98] sm:$0xff]  ;;  %v143_v26 = vpack.c.bf16 %v75_v23, %v73_v22  ;;  %v77_v28 = vld [vmem:[#allocation3 + $0x80] sm:$0xff] }
  0x43   :  { %595 = vmatprep.subr.bf16.mxu0 %v2124_v32  ;;  %v146_v27 = vpack.c.bf16 %v80_v25, %v78_v24  ;;  %v84_v31 = vld [vmem:[#allocation3 + $0xb8] sm:$0xff]  ;;  %v90_v42 = vld [vmem:[#allocation3 + $0xe8] sm:$0xff]  ;;  %v89_v46 = vld [vmem:[#allocation3 + $0xe0] sm:$0xff] }
  0x44   :  { %v92_v43 = vld [vmem:[#allocation3 + $0xf8] sm:$0xff]  ;;  %v103_v1 = vld [vmem:[#allocation3 + $0x150] sm:$0xff]  ;;  %v106_v2 = vld [vmem:[#allocation3 + $0x168] sm:$0xff] }
  0x45   :  { %819 = vmatpush1.bf16.msra.mxu1 %v2111_v29  ;;  %v79_v29 = vld [vmem:[#allocation3 + $0x90] sm:$0xff]  ;;  %v109_v12 = vld [vmem:[#allocation3 + $0x180] sm:$0xff] }
  0x46   :  { %820 = vmatprep.subr.bf16.mxu1 %v2114_v30  ;;  %596 = vmatpush1.bf16.msra.mxu0 %v2128_v35  ;;  %v82_v30 = vld [vmem:[#allocation3 + $0xa8] sm:$0xff]  ;;  %v145_v32 = vpack.c.bf16 %v79_v29, %v77_v28  ;;  %v83_v35 = vld [vmem:[#allocation3 + $0xb0] sm:$0xff]  ;;  %v113_v18 = vld [vmem:[#allocation3 + $0x1a0] sm:$0xff] }
  0x47   :  { %597 = vmatprep.subr.bf16.mxu0 %v2130_v36  ;;  %v86_v36 = vld [vmem:[#allocation3 + $0xc8] sm:$0xff]  ;;  %v111_v13 = vld [vmem:[#allocation3 + $0x190] sm:$0xff]  ;;  %v117_v24 = vld [vmem:[#allocation3 + $0x1c0] sm:$0xff] }
  0x48   :  { %v161_v16 = vpack.c.bf16 %v111_v13, %v109_v12  ;;  %v115_v19 = vld [vmem:[#allocation3 + $0x1b0] sm:$0xff] }
  0x49   :  { %821 = vmatpush2.bf16.msra.mxu1 %v2117_v33  ;;  %v148_v33 = vpack.c.bf16 %v84_v31, %v82_v30  ;;  %v163_v22 = vpack.c.bf16 %v115_v19, %v113_v18  ;;  %v119_v25 = vld [vmem:[#allocation3 + $0x1d0] sm:$0xff]  ;;  %v121_v30 = vld [vmem:[#allocation3 + $0x1e0] sm:$0xff] }
  0x4a   :  { %822 = vmatprep.subr.bf16.mxu1 %v2120_v34  ;;  %598 = vmatpush2.bf16.msra.mxu0 %v2134_v39  ;;  %v81_v34 = vld [vmem:[#allocation3 + $0xa0] sm:$0xff]  ;;  %v165_v28 = vpack.c.bf16 %v119_v25, %v117_v24  ;;  %v123_v31 = vld [vmem:[#allocation3 + $0x1f0] sm:$0xff] }
  0x4b   :  { %599 = vmatprep.subr.bf16.mxu0 %v2136_v40  ;;  %v85_v40 = vld [vmem:[#allocation3 + $0xc0] sm:$0xff] }
  0x4d   :  { %823 = vmatpush2.bf16.msra.mxu1 %v2123_v37  ;;  %v88_v37 = vld [vmem:[#allocation3 + $0xd8] sm:$0xff] }
  0x4e   :  { %824 = vmatprep.subr.bf16.mxu1 %v2126_v38  ;;  %600 = vmatpush2.bf16.msra.mxu0 %v2140_v45  ;;  %v147_v38 = vpack.c.bf16 %v83_v35, %v81_v34  ;;  %v150_v39 = vpack.c.bf16 %v88_v37, %v86_v36  ;;  %v152_v45 = vpack.c.bf16 %v92_v43, %v90_v42  ;;  %v125_v36 = vld [vmem:[#allocation3 + $0x200] sm:$0xff]  ;;  %v127_v37 = vld [vmem:[#allocation3 + $0x210] sm:$0xff] }
  0x4f   :  { %601 = vmatprep.subr.bf16.mxu0 %v2142_v47  ;;  %v91_v47 = vld [vmem:[#allocation3 + $0xf0] sm:$0xff]  ;;  %v167_v34 = vpack.c.bf16 %v123_v31, %v121_v30  ;;  %v129_v42 = vld [vmem:[#allocation3 + $0x220] sm:$0xff] }
  0x50   :  { %v131_v43 = vld [vmem:[#allocation3 + $0x230] sm:$0xff] }
  0x51   :  { %825 = vmatpush2.bf16.msra.mxu1 %v2129_v41  ;;  %v87_v41 = vld [vmem:[#allocation3 + $0xd0] sm:$0xff] }
  0x52   :  { %826 = vmatprep.subr.bf16.mxu1 %v2132_v44  ;;  %602 = vmatpush2.bf16.msra.mxu0 %v2146_v50  ;;  %v149_v44 = vpack.c.bf16 %v87_v41, %v85_v40  ;;  %v151_v50 = vpack.c.bf16 %v91_v47, %v89_v46  ;;  %v169_v40 = vpack.c.bf16 %v127_v37, %v125_v36 }
  0x53   :  { %603 = vmatprep.subr.bf16.mxu0 %v2148_v51  ;;  %v171_v46 = vpack.c.bf16 %v131_v43, %v129_v42 }
  0x55   :  { %827 = vmatpush2.bf16.msra.mxu1 %v2135_v48  ;;  %v94_v48 = vld [vmem:[#allocation3 + $0x108] sm:$0xff] }
  0x56   :  { %828 = vmatprep.subr.bf16.mxu1 %v2138_v49  ;;  %604 = vmatpush2.bf16.msra.mxu0 %v2152_v54  ;;  %v96_v49 = vld [vmem:[#allocation3 + $0x118] sm:$0xff]  ;;  %v98_v54 = vld [vmem:[#allocation3 + $0x128] sm:$0xff] }
  0x57   :  { %605 = vmatprep.subr.bf16.mxu0 %v2154_v55  ;;  %v154_v51 = vpack.c.bf16 %v96_v49, %v94_v48  ;;  %v100_v55 = vld [vmem:[#allocation3 + $0x138] sm:$0xff]  ;;  %v133_v48 = vld [vmem:[#allocation3 + $0x240] sm:$0xff]  ;;  %v135_v49 = vld [vmem:[#allocation3 + $0x250] sm:$0xff] }
  0x59   :  { %829 = vmatpush2.bf16.msra.mxu1 %v2141_v52  ;;  %v93_v52 = vld [vmem:[#allocation3 + $0x100] sm:$0xff] }
  0x5a   :  { %830 = vmatprep.subr.bf16.mxu1 %v2144_v53  ;;  %606 = vmatpush2.bf16.msra.mxu0 %v2158_v58  ;;  %v95_v53 = vld [vmem:[#allocation3 + $0x110] sm:$0xff]  ;;  %v97_v58 = vld [vmem:[#allocation3 + $0x120] sm:$0xff] }
  0x5b   :  { %607 = vmatprep.subr.bf16.mxu0 %v2160_v59  ;;  %v99_v59 = vld [vmem:[#allocation3 + $0x130] sm:$0xff] }
  0x5d   :  { %831 = vmatpush2.bf16.msra.mxu1 %v2147_v56  ;;  %v153_v56 = vpack.c.bf16 %v95_v53, %v93_v52 }
  0x5e   :  { %832 = vmatprep.subr.bf16.mxu1 %v2150_v57  ;;  %608 = vmatpush2.bf16.msra.mxu0 %v2162_v62  ;;  %v156_v57 = vpack.c.bf16 %v100_v55, %v98_v54  ;;  %v155_v62 = vpack.c.bf16 %v99_v59, %v97_v58  ;;  %v239_v54 = vld [vmem:[#allocation7] sm:$0xf] }
  0x5f   :  { %609 = vmatprep.subr.bf16.mxu0 %v2163_v63 }
  0x61   :  { %833 = vmatpush2.bf16.msra.mxu1 %v2153_v60  ;;  %v102_v60 = vld [vmem:[#allocation3 + $0x148] sm:$0xff] }
  0x62   :  { %834 = vmatprep.subr.bf16.mxu1 %v2156_v61  ;;  %610 = vmatpush2.bf16.msra.mxu0 %v2165_v3  ;;  %v104_v61 = vld [vmem:[#allocation3 + $0x158] sm:$0xff] }
  0x63   :  { %611 = vmatprep.subr.bf16.mxu0 %v2166_v6  ;;  %v158_v63 = vpack.c.bf16 %v104_v61, %v102_v60  ;;  %v108_v3 = vld [vmem:[#allocation3 + $0x178] sm:$0xff]  ;;  %v105_v6 = vld [vmem:[#allocation3 + $0x160] sm:$0xff] }
  0x64   :  { %v160_v5 = vpack.c.bf16 %v108_v3, %v106_v2 }
  0x65   :  { %835 = vmatpush2.bf16.msra.mxu1 %v2159_v0  ;;  %v101_v0 = vld [vmem:[#allocation3 + $0x140] sm:$0xff] }
  0x66   :  { %612 = vmatpush2.bf16.msra.mxu0 %v2168_v9  ;;  %v157_v4 = vpack.c.bf16 %v103_v1, %v101_v0  ;;  %v112_v9 = vld [vmem:[#allocation3 + $0x198] sm:$0xff] }
  0x68   :  { %837 = vmatmul.mubr.bf16.vlgmr.msra.gmra.mxu1 %v137_v7 }
  0x69   :  { %846 = vmatprep.mubr.bf16.mxu1 %v140_v8  ;;  %614 = vmatmul.mubr.bf16.vlgmr.msra.gmra.mxu0 %v137_v7  ;;  %v107_v7 = vld [vmem:[#allocation3 + $0x170] sm:$0xff] }
  0x6a   :  { %623 = vmatprep.mubr.bf16.mxu0 %v140_v8  ;;  %v110_v8 = vld [vmem:[#allocation3 + $0x188] sm:$0xff]  ;;  %v159_v10 = vpack.c.bf16 %v107_v7, %v105_v6 }
  0x6b   :  { %v162_v11 = vpack.c.bf16 %v112_v9, %v110_v8 }
  0x70   :  { %847 = vmatmul.mubr.bf16.gmra.mxu1 %v139_v14 }
  0x71   :  { %856 = vmatprep.mubr.bf16.mxu1 %v142_v15  ;;  %624 = vmatmul.mubr.bf16.gmra.mxu0 %v139_v14  ;;  %v114_v14 = vld [vmem:[#allocation3 + $0x1a8] sm:$0xff] }
  0x72   :  { %633 = vmatprep.mubr.bf16.mxu0 %v142_v15  ;;  %v116_v15 = vld [vmem:[#allocation3 + $0x1b8] sm:$0xff] }
  0x73   :  { %v164_v17 = vpack.c.bf16 %v116_v15, %v114_v14 }
  0x78   :  { %857 = vmatmul.mubr.bf16.gmra.mxu1 %v141_v20 }
  0x79   :  { %866 = vmatprep.mubr.bf16.mxu1 %v144_v21  ;;  %634 = vmatmul.mubr.bf16.gmra.mxu0 %v141_v20  ;;  %v118_v20 = vld [vmem:[#allocation3 + $0x1c8] sm:$0xff] }
  0x7a   :  { %643 = vmatprep.mubr.bf16.mxu0 %v144_v21  ;;  %v120_v21 = vld [vmem:[#allocation3 + $0x1d8] sm:$0xff] }
  0x7b   :  { %v166_v23 = vpack.c.bf16 %v120_v21, %v118_v20 }
  0x80   :  { %867 = vmatmul.mubr.bf16.gmra.mxu1 %v143_v26 }
  0x81   :  { %876 = vmatprep.mubr.bf16.mxu1 %v146_v27  ;;  %644 = vmatmul.mubr.bf16.gmra.mxu0 %v143_v26  ;;  %v122_v26 = vld [vmem:[#allocation3 + $0x1e8] sm:$0xff] }
  0x82   :  { %653 = vmatprep.mubr.bf16.mxu0 %v146_v27  ;;  %v124_v27 = vld [vmem:[#allocation3 + $0x1f8] sm:$0xff] }
  0x83   :  { %v168_v29 = vpack.c.bf16 %v124_v27, %v122_v26 }
  0x88   :  { %877 = vmatmul.mubr.bf16.gmra.mxu1 %v145_v32 }
  0x89   :  { %886 = vmatprep.mubr.bf16.mxu1 %v148_v33  ;;  %654 = vmatmul.mubr.bf16.gmra.mxu0 %v145_v32  ;;  %v126_v32 = vld [vmem:[#allocation3 + $0x208] sm:$0xff] }
  0x8a   :  { %663 = vmatprep.mubr.bf16.mxu0 %v148_v33  ;;  %v128_v33 = vld [vmem:[#allocation3 + $0x218] sm:$0xff] }
  0x8b   :  { %v170_v35 = vpack.c.bf16 %v128_v33, %v126_v32 }
  0x90   :  { %887 = vmatmul.mubr.bf16.gmra.mxu1 %v147_v38 }
  0x91   :  { %896 = vmatprep.mubr.bf16.mxu1 %v150_v39  ;;  %664 = vmatmul.mubr.bf16.gmra.mxu0 %v147_v38  ;;  %v130_v38 = vld [vmem:[#allocation3 + $0x228] sm:$0xff] }
  0x92   :  { %673 = vmatprep.mubr.bf16.mxu0 %v150_v39  ;;  %v132_v39 = vld [vmem:[#allocation3 + $0x238] sm:$0xff] }
  0x93   :  { %v172_v41 = vpack.c.bf16 %v132_v39, %v130_v38 }
  0x98   :  { %897 = vmatmul.mubr.bf16.gmra.mxu1 %v149_v44 }
  0x99   :  { %906 = vmatprep.mubr.bf16.mxu1 %v152_v45  ;;  %674 = vmatmul.mubr.bf16.gmra.mxu0 %v149_v44  ;;  %v134_v44 = vld [vmem:[#allocation3 + $0x248] sm:$0xff] }
  0x9a   :  { %683 = vmatprep.mubr.bf16.mxu0 %v152_v45  ;;  %v136_v45 = vld [vmem:[#allocation3 + $0x258] sm:$0xff] }
  0x9b   :  { %v174_v47 = vpack.c.bf16 %v136_v45, %v134_v44 }
  0xa0   :  { %907 = vmatmul.mubr.bf16.gmra.mxu1 %v151_v50 }
  0xa1   :  { %916 = vmatprep.mubr.bf16.mxu1 %v154_v51  ;;  %684 = vmatmul.mubr.bf16.gmra.mxu0 %v151_v50  ;;  %v173_v50 = vpack.c.bf16 %v135_v49, %v133_v48 }
  0xa2   :  { %693 = vmatprep.mubr.bf16.mxu0 %v154_v51  ;;  %v241_v51 = vlaneseq }
  0xa4   :  { %v2736_v52 = vshrl.u32 %v241_v51, 7 }
  0xa6   :  { %v251_v53 = vsub.s32 2, %v2736_v52  ;;  %v255_v55 = vsub.s32 3, %v2736_v52  ;;  %v247_v60 = vsub.s32 1, %v2736_v52 }
  0xa8   :  { %917 = vmatmul.mubr.bf16.gmra.mxu1 %v153_v56  ;;  %v2743_v58 = vrot.slane %v239_v54, %v255_v55  ;;  %v2754_v3 = vrot.slane %v239_v54, %v247_v60 }
  0xa9   :  { %926 = vmatprep.mubr.bf16.mxu1 %v156_v57  ;;  %694 = vmatmul.mubr.bf16.gmra.mxu0 %v153_v56  ;;  %v2740_v56 = vrot.slane %v239_v54, %v251_v53 }
  0xaa   :  { %703 = vmatprep.mubr.bf16.mxu0 %v156_v57  ;;  %v243_v57 = vsub.s32 0, %v2736_v52 }
  0xb0   :  { %927 = vmatmul.mubr.bf16.gmra.mxu1 %v155_v62 }
  0xb1   :  { %936 = vmatprep.mubr.bf16.mxu1 %v158_v63  ;;  %704 = vmatmul.mubr.bf16.gmra.mxu0 %v155_v62 }
  0xb2   :  { %713 = vmatprep.mubr.bf16.mxu0 %v158_v63  ;;  %v2749_v63 = vrot.slane %v239_v54, %v243_v57 }
  0xb8   :  { %937 = vmatmul.mubr.bf16.gmra.mxu1 %v157_v4 }
  0xb9   :  { %946 = vmatprep.mubr.bf16.mxu1 %v160_v5  ;;  %714 = vmatmul.mubr.bf16.gmra.mxu0 %v157_v4 }
  0xba   :  { %723 = vmatprep.mubr.bf16.mxu0 %v160_v5 }
  0xc0   :  { %947 = vmatmul.mubr.bf16.gmra.mxu1 %v159_v10 }
  0xc1   :  { %956 = vmatprep.mubr.bf16.mxu1 %v162_v11  ;;  %724 = vmatmul.mubr.bf16.gmra.mxu0 %v159_v10 }
  0xc2   :  { %733 = vmatprep.mubr.bf16.mxu0 %v162_v11 }
  0xc8   :  { %957 = vmatmul.mubr.bf16.gmra.mxu1 %v161_v16 }
  0xc9   :  { %966 = vmatprep.mubr.bf16.mxu1 %v164_v17  ;;  %734 = vmatmul.mubr.bf16.gmra.mxu0 %v161_v16 }
  0xca   :  { %743 = vmatprep.mubr.bf16.mxu0 %v164_v17 }
  0xd0   :  { %967 = vmatmul.mubr.bf16.gmra.mxu1 %v163_v22 }
  0xd1   :  { %976 = vmatprep.mubr.bf16.mxu1 %v166_v23  ;;  %744 = vmatmul.mubr.bf16.gmra.mxu0 %v163_v22 }
  0xd2   :  { %753 = vmatprep.mubr.bf16.mxu0 %v166_v23 }
  0xd8   :  { %977 = vmatmul.mubr.bf16.gmra.mxu1 %v165_v28 }
  0xd9   :  { %986 = vmatprep.mubr.bf16.mxu1 %v168_v29  ;;  %754 = vmatmul.mubr.bf16.gmra.mxu0 %v165_v28 }
  0xda   :  { %763 = vmatprep.mubr.bf16.mxu0 %v168_v29 }
  0xe0   :  { %987 = vmatmul.mubr.bf16.gmra.mxu1 %v167_v34 }
  0xe1   :  { %996 = vmatprep.mubr.bf16.mxu1 %v170_v35  ;;  %764 = vmatmul.mubr.bf16.gmra.mxu0 %v167_v34 }
  0xe2   :  { %773 = vmatprep.mubr.bf16.mxu0 %v170_v35 }
  0xe8   :  { %997 = vmatmul.mubr.bf16.gmra.mxu1 %v169_v40 }
  0xe9   :  { %1006 = vmatprep.mubr.bf16.mxu1 %v172_v41  ;;  %774 = vmatmul.mubr.bf16.gmra.mxu0 %v169_v40 }
  0xea   :  { %783 = vmatprep.mubr.bf16.mxu0 %v172_v41 }
  0xf0   :  { %1007 = vmatmul.mubr.bf16.gmra.mxu1 %v171_v46 }
  0xf1   :  { %1016 = vmatprep.mubr.bf16.mxu1 %v174_v47  ;;  %784 = vmatmul.mubr.bf16.gmra.mxu0 %v171_v46 }
  0xf2   :  { %793 = vmatprep.mubr.bf16.mxu0 %v174_v47 }
  0xf8   :  { %1017 = vmatmul.mubr.bf16.gmra.mxu1 %v173_v50 }
  0xf9   :  { %794 = vmatmul.mubr.bf16.gmra.mxu0 %v173_v50 }
 0x128   :  { %v838_v59 = vpop.f32.mrf.mxu1 }
 0x129   :  { %v839_v61 = vadd.f32 %v838_v59, %v2740_v56  ;;  %v615_v6 = vpop.f32.mrf.mxu0 }
 0x12a   :  { %v840_v62 = vpop.f32.mrf.mxu1  ;;  %v616_v8 = vadd.f32 %v615_v6, %v2749_v63 }
 0x12b   :  { %v1991_v0 = vmul.f32 -1.442695, %v839_v61  ;;  %v841_v1 = vadd.f32 %v840_v62, %v2743_v58  ;;  %v617_v11 = vpop.f32.mrf.mxu0 }
 0x12c   :  { %v842_v2 = vpop.f32.mrf.mxu1  ;;  %v618_v13 = vadd.f32 %v617_v11, %v2754_v3 }
 0x12d   :  { %2169 = vpow2.f32 %v1991_v0  ;;  %v1992_v4 = vmul.f32 -1.442695, %v841_v1  ;;  %v843_v5 = vadd.f32 %v842_v2, %v2740_v56  ;;  %v619_v16 = vpop.f32.mrf.mxu0 }
 0x12e   :  { %v844_v7 = vpop.f32.mrf.mxu1  ;;  %v620_v18 = vadd.f32 %v619_v16, %v2749_v63 }
 0x12f   :  { %2171 = vpow2.f32 %v1992_v4  ;;  %v1993_v9 = vmul.f32 -1.442695, %v843_v5  ;;  %v845_v10 = vadd.f32 %v844_v7, %v2743_v58  ;;  %v621_v21 = vpop.f32.mrf.mxu0 }
 0x130   :  { %v848_v12 = vpop.f32.mrf.mxu1  ;;  %2173 = vtanh.f32 %v616_v8  ;;  %v622_v23 = vadd.f32 %v621_v21, %v2754_v3 }
 0x131   :  { %2175 = vpow2.f32 %v1993_v9  ;;  %v1994_v14 = vmul.f32 -1.442695, %v845_v10  ;;  %v849_v15 = vadd.f32 %v848_v12, %v2740_v56  ;;  %v625_v26 = vpop.f32.mrf.mxu0 }
 0x132   :  { %v850_v17 = vpop.f32.mrf.mxu1  ;;  %2177 = vtanh.f32 %v618_v13  ;;  %v626_v28 = vadd.f32 %v625_v26, %v2749_v63 }
 0x133   :  { %2179 = vpow2.f32 %v1994_v14  ;;  %v1995_v19 = vmul.f32 -1.442695, %v849_v15  ;;  %v851_v20 = vadd.f32 %v850_v17, %v2743_v58  ;;  %v627_v31 = vpop.f32.mrf.mxu0 }
 0x134   :  { %v852_v22 = vpop.f32.mrf.mxu1  ;;  %2181 = vtanh.f32 %v620_v18  ;;  %v628_v33 = vadd.f32 %v627_v31, %v2754_v3 }
 0x135   :  { %2183 = vpow2.f32 %v1995_v19  ;;  %v1996_v24 = vmul.f32 -1.442695, %v851_v20  ;;  %v853_v25 = vadd.f32 %v852_v22, %v2740_v56  ;;  %v629_v36 = vpop.f32.mrf.mxu0 }
 0x136   :  { %v854_v27 = vpop.f32.mrf.mxu1  ;;  %2185 = vtanh.f32 %v622_v23  ;;  %v630_v39 = vadd.f32 %v629_v36, %v2749_v63 }
 0x137   :  { %2187 = vpow2.f32 %v1996_v24  ;;  %v1997_v29 = vmul.f32 -1.442695, %v853_v25  ;;  %v855_v30 = vadd.f32 %v854_v27, %v2743_v58  ;;  %v631_v43 = vpop.f32.mrf.mxu0 }
 0x138   :  { %v858_v32 = vpop.f32.mrf.mxu1  ;;  %2189 = vtanh.f32 %v626_v28  ;;  %v632_v16 = vadd.f32 %v631_v43, %v2754_v3  ;;  %v1635_v28 = vld [vmem:[%s3509_s3] sm:$0x3] }
 0x139   :  { %2191 = vpow2.f32 %v1997_v29  ;;  %v1998_v34 = vmul.f32 -1.442695, %v855_v30  ;;  %v859_v35 = vadd.f32 %v858_v32, %v2740_v56  ;;  %v635_v50 = vpop.f32.mrf.mxu0 }
 0x13a   :  { %v2170_v37 = vpop.eup %2169  ;;  %v860_v38 = vpop.f32.mrf.mxu1  ;;  %2193 = vtanh.f32 %v628_v33  ;;  %v636_v30 = vadd.f32 %v635_v50, %v2749_v63 }
 0x13b   :  { %v1331_v40 = vadd.f32 1.0, %v2170_v37  ;;  %2195 = vpow2.f32 %v1998_v34  ;;  %v1999_v41 = vmul.f32 -1.442695, %v859_v35  ;;  %v861_v42 = vadd.f32 %v860_v38, %v2743_v58  ;;  %v637_v62 = vpop.f32.mrf.mxu0 }
 0x13c   :  { %v2172_v44 = vpop.eup %2171  ;;  %v862_v45 = vpop.f32.mrf.mxu1  ;;  %2197 = vtanh.f32 %v630_v39  ;;  %v2806_v39 = vrot.slane %v1635_v28, %v243_v57 }
 0x13d   :  { %v2771_v46 = vpop.eup %2173  ;;  %2199 = vrcp.f32 %v1331_v40  ;;  %v1332_v47 = vadd.f32 1.0, %v2172_v44  ;;  %v2000_v48 = vmul.f32 -1.442695, %v861_v42  ;;  %v863_v49 = vadd.f32 %v862_v45, %v2740_v56  ;;  %v639_v7 = vpop.f32.mrf.mxu0 }
 0x13e   :  { %v2176_v51 = vpop.eup %2175  ;;  %2201 = vpow2.f32 %v1999_v41  ;;  %v864_v53 = vpop.f32.mrf.mxu1  ;;  %v638_v41 = vadd.f32 %v637_v62, %v2754_v3  ;;  %v2814_v44 = vrot.slane %v1635_v28, %v247_v60  ;;  %v640_v52 = vadd.f32 %v639_v7, %v2749_v63 }
 0x13f   :  { %v2774_v54 = vpop.eup %2177  ;;  %2203 = vrcp.f32 %v1332_v47  ;;  %v1333_v55 = vadd.f32 1.0, %v2176_v51  ;;  %v2001_v59 = vmul.f32 -1.442695, %v863_v49  ;;  %v865_v61 = vadd.f32 %v864_v53, %v2743_v58  ;;  %v2783_v14 = vpop.f32.mrf.mxu0 }
 0x140   :  { %v2180_v0 = vpop.eup %2179  ;;  %2205 = vpow2.f32 %v2000_v48  ;;  %v868_v1 = vpop.f32.mrf.mxu1 }
 0x141   :  { %v2777_v2 = vpop.eup %2181  ;;  %2207 = vrcp.f32 %v1333_v55  ;;  %v1334_v4 = vadd.f32 1.0, %v2180_v0  ;;  %v2002_v5 = vmul.f32 -1.442695, %v865_v61  ;;  %v869_v6 = vadd.f32 %v868_v1, %v2740_v56  ;;  %v2789_v21 = vpop.f32.mrf.mxu0 }
 0x142   :  { %v2184_v8 = vpop.eup %2183  ;;  %2209 = vpow2.f32 %v2001_v59  ;;  %v870_v9 = vpop.f32.mrf.mxu1 }
 0x143   :  { %v2780_v10 = vpop.eup %2185  ;;  %2211 = vrcp.f32 %v1334_v4  ;;  %v1335_v11 = vadd.f32 1.0, %v2184_v8  ;;  %v2003_v12 = vmul.f32 -1.442695, %v869_v6  ;;  %v871_v13 = vadd.f32 %v870_v9, %v2743_v58  ;;  %v2793_v27 = vpop.f32.mrf.mxu0 }
 0x144   :  { %v2188_v15 = vpop.eup %2187  ;;  %2213 = vpow2.f32 %v2002_v5  ;;  %v872_v17 = vpop.f32.mrf.mxu1 }
 0x145   :  { %v2786_v18 = vpop.eup %2189  ;;  %2215 = vrcp.f32 %v1335_v11  ;;  %v1336_v19 = vadd.f32 1.0, %v2188_v15  ;;  %v873_v20 = vadd.f32 %v872_v17, %v2740_v56  ;;  %v2004_v23 = vmul.f32 -1.442695, %v871_v13  ;;  %v2802_v36 = vpop.f32.mrf.mxu0 }
 0x146   :  { %v2192_v22 = vpop.eup %2191  ;;  %2217 = vpow2.f32 %v2003_v12  ;;  %v874_v24 = vpop.f32.mrf.mxu1 }
 0x147   :  { %v2791_v25 = vpop.eup %2193  ;;  %2219 = vrcp.f32 %v1336_v19  ;;  %v1337_v26 = vadd.f32 1.0, %v2192_v22  ;;  %v2005_v34 = vmul.f32 -1.442695, %v873_v20  ;;  %v875_v35 = vadd.f32 %v874_v24, %v2743_v58  ;;  %v2809_v42 = vpop.f32.mrf.mxu0 }
 0x148   :  { %v2196_v29 = vpop.eup %2195  ;;  %2221 = vtanh.f32 %v632_v16  ;;  %v878_v31 = vpop.f32.mrf.mxu1  ;;  %v642_v19 = vadd.f32 %v2783_v14, %v2754_v3 }
 0x149   :  { %v2799_v32 = vpop.eup %2197  ;;  %2223 = vrcp.f32 %v1337_v26  ;;  %v1338_v33 = vadd.f32 1.0, %v2196_v29  ;;  %v2006_v57 = vmul.f32 -1.442695, %v875_v35  ;;  %v879_v50 = vadd.f32 %v878_v31, %v2740_v56  ;;  %v2818_v53 = vpop.f32.mrf.mxu0 }
 0x14a   :  { %v2200_v37 = vpop.eup %2199  ;;  %2225 = vpow2.f32 %v2004_v23  ;;  %v880_v38 = vpop.f32.mrf.mxu1 }
 0x14b   :  { %v2202_v40 = vpop.eup %2201  ;;  %2227 = vrcp.f32 %v1338_v33  ;;  %v1559_v43 = vmul.f32 %v2200_v37, %v2771_v46  ;;  %v881_v61 = vadd.f32 %v880_v38, %v2743_v58  ;;  %v2824_v1 = vpop.f32.mrf.mxu0  ;;  %v2007_v7 = vmul.f32 -1.442695, %v879_v50 }
 0x14c   :  { %v2204_v45 = vpop.eup %2203  ;;  %v1339_v47 = vadd.f32 1.0, %v2202_v40  ;;  %2229 = vtanh.f32 %v636_v30  ;;  %v882_v48 = vpop.f32.mrf.mxu1  ;;  %v646_v30 = vadd.f32 %v2789_v21, %v2749_v63 }
 0x14d   :  { %v2206_v49 = vpop.eup %2205  ;;  %2231 = vpow2.f32 %v2005_v34  ;;  %v1560_v51 = vmul.f32 %v2204_v45, %v2774_v54  ;;  %v1647_v62 = vmul.f32 %v2806_v39, %v1559_v43  ;;  %v2827_v11 = vpop.f32.mrf.mxu0  ;;  %v2008_v20 = vmul.f32 -1.442695, %v881_v61 }
 0x14e   :  { %v2208_v55 = vpop.eup %2207  ;;  %2233 = vrcp.f32 %v1339_v47  ;;  %v1340_v46 = vadd.f32 1.0, %v2206_v49  ;;  %v884_v60 = vpop.f32.mrf.mxu1  ;;  %v648_v43 = vadd.f32 %v2793_v27, %v2754_v3 }
 0x14f   :  { %v2210_v59 = vpop.eup %2209  ;;  %2235 = vtanh.f32 %v638_v41  ;;  %v1648_v0 = vmul.f32 %v2814_v44, %v1560_v51  ;;  %v1561_v6 = vmul.f32 %v2208_v55, %v2777_v2  ;;  %v883_v2 = vadd.f32 %v882_v48, %v2740_v56  ;;  %v2833_v22 = vpop.f32.mrf.mxu0 }
 0x150   :  { %v2212_v4 = vpop.eup %2211  ;;  %2237 = vrcp.f32 %v1340_v46  ;;  %v1341_v54 = vadd.f32 1.0, %v2210_v59  ;;  %v888_v5 = vpop.f32.mrf.mxu1  ;;  %v885_v34 = vadd.f32 %v884_v60, %v2743_v58 }
 0x151   :  { %v2214_v8 = vpop.eup %2213  ;;  %2239 = vpow2.f32 %v2006_v57  ;;  %v1723_v9 = vadd.f32 %v1648_v0, %v1647_v62  ;;  %v1562_v16 = vmul.f32 %v2212_v4, %v2780_v10  ;;  %v1649_v28 = vmul.f32 %v2806_v39, %v1561_v6  ;;  %v2840_v31 = vpop.f32.mrf.mxu0 }
 0x152   :  { %v2216_v12 = vpop.eup %2215  ;;  %2241 = vrcp.f32 %v1341_v54  ;;  %v1342_v13 = vadd.f32 1.0, %v2214_v8  ;;  %v890_v15 = vpop.f32.mrf.mxu1  ;;  %v2009_v41 = vmul.f32 -1.442695, %v883_v2  ;;  %v889_v21 = vadd.f32 %v888_v5, %v2740_v56 }
 0x153   :  { %v2218_v17 = vpop.eup %2217  ;;  %2243 = vtanh.f32 %v640_v52  ;;  %1724 = vadd.xlane.f32.xlu0 %v1723_v9  ;;  %v1650_v29 = vmul.f32 %v2814_v44, %v1562_v16  ;;  %v1563_v14 = vmul.f32 %v2216_v12, %v2786_v18  ;;  %v2849_v18 = vpop.f32.mrf.mxu0  ;;  %v2010_v55 = vmul.f32 -1.442695, %v885_v34 }
 0x154   :  { %v2220_v23 = vpop.eup %2219  ;;  %2245 = vrcp.f32 %v1342_v13  ;;  %v1343_v24 = vadd.f32 1.0, %v2218_v17  ;;  %v892_v26 = vpop.f32.mrf.mxu1  ;;  %v650_v62 = vadd.f32 %v2802_v36, %v2749_v63  ;;  %v891_v0 = vadd.f32 %v890_v15, %v2743_v58 }
 0x155   :  { %v2222_v10 = vpop.eup %2221  ;;  %2247 = vpow2.f32 %v2007_v7  ;;  %v1726_v37 = vadd.f32 %v1650_v29, %v1649_v28  ;;  %v1564_v38 = vmul.f32 %v2220_v23, %v2791_v25  ;;  %v1651_v49 = vmul.f32 %v2806_v39, %v1563_v14  ;;  %v2856_v51 = vpop.f32.mrf.mxu0 }
 0x156   :  { %v2224_v33 = vpop.eup %2223  ;;  %2249 = vrcp.f32 %v1343_v24  ;;  %v2843_v35 = vpop.f32.mrf.mxu1  ;;  %v2011_v54 = vmul.f32 -1.442695, %v889_v21  ;;  %v652_v9 = vadd.f32 %v2809_v42, %v2754_v3  ;;  %v893_v15 = vadd.f32 %v892_v26, %v2740_v56 }
 0x157   :  { %v2226_v40 = vpop.eup %2225  ;;  %2251 = vtanh.f32 %v642_v19  ;;  %1727 = vadd.xlane.f32.xlu0 %v1726_v37  ;;  %v1652_v25 = vmul.f32 %v2814_v44, %v1564_v38  ;;  %v1565_v50 = vmul.f32 %v2224_v33, %v2799_v32  ;;  %v2863_v4 = vpop.f32.mrf.mxu0  ;;  %v2012_v23 = vmul.f32 -1.442695, %v891_v0 }
 0x158   :  { %v2228_v45 = vpop.eup %2227  ;;  %v1344_v47 = vadd.f32 1.0, %v2226_v40  ;;  %2253 = vpow2.f32 %v2008_v20  ;;  %v2851_v48 = vpop.f32.mrf.mxu1  ;;  %v656_v42 = vadd.f32 %v2818_v53, %v2749_v63  ;;  %v895_v14 = vadd.f32 %v2843_v35, %v2743_v58 }
 0x159   :  { %v2230_v57 = vpop.eup %2229  ;;  %2255 = vtanh.f32 %v646_v30  ;;  %v1729_v52 = vadd.f32 %v1652_v25, %v1651_v49  ;;  %v1566_v60 = vmul.f32 %v2228_v45, %v2222_v10  ;;  %v1653_v6 = vmul.f32 %v2806_v39, %v1565_v50  ;;  %v2871_v12 = vpop.f32.mrf.mxu0 }
 0x15a   :  { %v2232_v27 = vpop.eup %2231  ;;  %2257 = vrcp.f32 %v1344_v47  ;;  %v2858_v46 = vpop.f32.mrf.mxu1  ;;  %v2013_v37 = vmul.f32 -1.442695, %v893_v15  ;;  %v899_v35 = vadd.f32 %v2851_v48, %v2740_v56 }
 0x15b   :  { %v2234_v59 = vpop.eup %2233  ;;  %v1345_v61 = vadd.f32 1.0, %v2232_v27  ;;  %2259 = vpow2.f32 %v2009_v41  ;;  %1730 = vadd.xlane.f32.xlu1 %v1729_v52  ;;  %v1654_v8 = vmul.f32 %v2814_v44, %v1566_v60  ;;  %v2876_v24 = vpop.f32.mrf.mxu0  ;;  %v901_v48 = vadd.f32 %v2858_v46, %v2743_v58 }
 0x15c   :  { %v2236_v32 = vpop.eup %2235  ;;  %2261 = vtanh.f32 %v648_v43  ;;  %v2865_v5 = vpop.f32.mrf.mxu1  ;;  %v1567_v36 = vmul.f32 %v2234_v59, %v2230_v57  ;;  %v658_v43 = vadd.f32 %v2824_v1, %v2754_v3  ;;  %v2014_v57 = vmul.f32 -1.442695, %v895_v14 }
 0x15d   :  { %v2238_v7 = vpop.eup %2237  ;;  %2263 = vrcp.f32 %v1345_v61  ;;  %v1732_v17 = vadd.f32 %v1654_v8, %v1653_v6  ;;  %v2886_v33 = vpop.f32.mrf.mxu0  ;;  %v660_v1 = vadd.f32 %v2827_v11, %v2749_v63  ;;  %v662_v6 = vadd.f32 %v2833_v22, %v2754_v3 }
 0x15e   :  { %v2240_v13 = vpop.eup %2239  ;;  %2265 = vpow2.f32 %v2010_v55  ;;  %v2874_v16 = vpop.f32.mrf.mxu1  ;;  %v1568_v19 = vmul.f32 %v2238_v7, %v2236_v32  ;;  %v1655_v26 = vmul.f32 %v2806_v39, %v1567_v36  ;;  %v903_v46 = vadd.f32 %v2865_v5, %v2740_v56 }
 0x15f   :  { %v2242_v20 = vpop.eup %2241  ;;  %v1346_v2 = vadd.f32 1.0, %v2240_v13  ;;  %2267 = vtanh.f32 %v650_v62  ;;  %1733 = vadd.xlane.f32.xlu1 %v1732_v17  ;;  %v2892_v45 = vpop.f32.mrf.mxu0  ;;  %v2016_v22 = vmul.f32 -1.442695, %v901_v48 }
 0x160   :  { %v2244_v28 = vpop.eup %2243  ;;  %2269 = vpow2.f32 %v2011_v54  ;;  %v2880_v29 = vpop.f32.mrf.mxu1  ;;  %v1656_v10 = vmul.f32 %v2814_v44, %v1568_v19  ;;  %v2015_v54 = vmul.f32 -1.442695, %v899_v35  ;;  %v2017_v14 = vmul.f32 -1.442695, %v903_v46 }
 0x161   :  { %v2246_v30 = vpop.eup %2245  ;;  %2271 = vrcp.f32 %v1346_v2  ;;  %v1569_v21 = vmul.f32 %v2244_v28, %v2242_v20  ;;  %v2898_v27 = vpop.f32.mrf.mxu0  ;;  %v909_v35 = vadd.f32 %v2880_v29, %v2740_v56 }
 0x162   :  { %v2248_v34 = vpop.eup %2247  ;;  %2273 = vtanh.f32 %v652_v9  ;;  %v2888_v38 = vpop.f32.mrf.mxu1  ;;  %v1735_v53 = vadd.f32 %v1656_v10, %v1655_v26 }
 0x163   :  { %v2250_v40 = vpop.eup %2249  ;;  %v1347_v41 = vadd.f32 1.0, %v2248_v34  ;;  %2275 = vpow2.f32 %v2012_v23  ;;  %v1657_v61 = vmul.f32 %v2806_v39, %v1569_v21  ;;  %v2908_v0 = vpop.f32.mrf.mxu0  ;;  %v905_v34 = vadd.f32 %v2874_v16, %v2743_v58 }
 0x164   :  { %v2252_v47 = vpop.eup %2251  ;;  %2277 = vtanh.f32 %v656_v42  ;;  %1736 = vadd.xlane.f32.xlu0 %v1735_v53  ;;  %v2896_v49 = vpop.f32.mrf.mxu1  ;;  %v668_v16 = vadd.f32 %v2849_v18, %v2754_v3  ;;  %v670_v18 = vadd.f32 %v2856_v51, %v2749_v63 }
 0x165   :  { %v2254_v25 = vpop.eup %2253  ;;  %2279 = vrcp.f32 %v1347_v41  ;;  %v1570_v50 = vmul.f32 %v2252_v47, %v2246_v30  ;;  %v2916_v13 = vpop.f32.mrf.mxu0  ;;  %v666_v30 = vadd.f32 %v2840_v31, %v2749_v63 }
 0x166   :  { %v2256_v55 = vpop.eup %2255  ;;  %v1348_v52 = vadd.f32 1.0, %v2254_v25  ;;  %2281 = vpow2.f32 %v2013_v37  ;;  %v2902_v60 = vpop.f32.mrf.mxu1 }
 0x167   :  { %v2258_v59 = vpop.eup %2257  ;;  %2283 = vtanh.f32 %v658_v43  ;;  %v1658_v62 = vmul.f32 %v2814_v44, %v1570_v50  ;;  %v1571_v8 = vmul.f32 %v2256_v55, %v2250_v40  ;;  %v2920_v2 = vpop.f32.mrf.mxu0 }
 0x168   :  { %v2260_v32 = vpop.eup %2259  ;;  %2285 = vrcp.f32 %v1348_v52  ;;  %v2912_v11 = vpop.f32.mrf.mxu1 }
 0x169   :  { %v2262_v7 = vpop.eup %2261  ;;  %v1349_v9 = vadd.f32 1.0, %v2260_v32  ;;  %2287 = vpow2.f32 %v2014_v57  ;;  %v1738_v36 = vadd.f32 %v1658_v62, %v1657_v61  ;;  %v1659_v42 = vmul.f32 %v2806_v39, %v1571_v8  ;;  %v2930_v37 = vpop.f32.mrf.mxu0 }
 0x16a   :  { %v2264_v15 = vpop.eup %2263  ;;  %2289 = vtanh.f32 %v660_v1  ;;  %v2918_v17 = vpop.f32.mrf.mxu1  ;;  %v1572_v19 = vmul.f32 %v2262_v7, %v2258_v59  ;;  %v2018_v1 = vmul.f32 -1.442695, %v905_v34 }
 0x16b   :  { %v2266_v20 = vpop.eup %2265  ;;  %2291 = vrcp.f32 %v1349_v9  ;;  %1739 = vadd.xlane.f32.xlu1 %v1738_v36  ;;  %v2936_v25 = vpop.f32.mrf.mxu0 }
 0x16c   :  { %v2268_v23 = vpop.eup %2267  ;;  %v1350_v28 = vadd.f32 1.0, %v2266_v20  ;;  %2293 = vpow2.f32 %v2015_v54  ;;  %v1660_v5 = vmul.f32 %v2814_v44, %v1572_v19  ;;  %v2924_v26 = vpop.f32.mrf.mxu1  ;;  %v2019_v54 = vmul.f32 -1.442695, %v909_v35 }
 0x16d   :  { %v2270_v10 = vpop.eup %2269  ;;  %2295 = vtanh.f32 %v662_v6  ;;  %v1573_v21 = vmul.f32 %v2268_v23, %v2264_v15  ;;  %v2942_v59 = vpop.f32.mrf.mxu0  ;;  %v911_v6 = vadd.f32 %v2888_v38, %v2743_v58  ;;  %v913_v20 = vadd.f32 %v2896_v49, %v2740_v56 }
 0x16e   :  { %v2272_v53 = vpop.eup %2271  ;;  %2297 = vrcp.f32 %v1350_v28  ;;  %v1351_v40 = vadd.f32 1.0, %v2270_v10  ;;  %v1741_v41 = vadd.f32 %v1660_v5, %v1659_v42  ;;  %v2932_v43 = vpop.f32.mrf.mxu1  ;;  %v672_v38 = vadd.f32 %v2863_v4, %v2754_v3 }
 0x16f   :  { %v2274_v47 = vpop.eup %2273  ;;  %2299 = vpow2.f32 %v2016_v22  ;;  %v1661_v29 = vmul.f32 %v2806_v39, %v1573_v21  ;;  %v2952_v8 = vpop.f32.mrf.mxu0  ;;  %v2020_v10 = vmul.f32 -1.442695, %v911_v6  ;;  %v676_v4 = vadd.f32 %v2871_v12, %v2749_v63 }
 0x170   :  { %v2276_v31 = vpop.eup %2275  ;;  %2301 = vrcp.f32 %v1351_v40  ;;  %1742 = vadd.xlane.f32.xlu0 %v1741_v41  ;;  %v1574_v57 = vmul.f32 %v2274_v47, %v2272_v53  ;;  %v2940_v50 = vpop.f32.mrf.mxu1  ;;  %v2021_v41 = vmul.f32 -1.442695, %v913_v20  ;;  %v915_v21 = vadd.f32 %v2902_v60, %v2743_v58 }
 0x171   :  { %v2278_v55 = vpop.eup %2277  ;;  %v1352_v52 = vadd.f32 1.0, %v2276_v31  ;;  %2303 = vtanh.f32 %v666_v30  ;;  %v2958_v22 = vpop.f32.mrf.mxu0  ;;  %v678_v12 = vadd.f32 %v2876_v24, %v2754_v3  ;;  %v680_v24 = vadd.f32 %v2886_v33, %v2749_v63 }
 0x172   :  { %v2280_v48 = vpop.eup %2279  ;;  %2305 = vpow2.f32 %v2017_v14  ;;  %v1662_v61 = vmul.f32 %v2814_v44, %v1574_v57  ;;  %v2946_v62 = vpop.f32.mrf.mxu1  ;;  %v682_v33 = vadd.f32 %v2892_v45, %v2754_v3 }
 0x173   :  { %v2282_v32 = vpop.eup %2281  ;;  %2307 = vrcp.f32 %v1352_v52  ;;  %v1575_v36 = vmul.f32 %v2280_v48, %v2278_v55  ;;  %v2964_v30 = vpop.f32.mrf.mxu0 }
 0x174   :  { %v2284_v7 = vpop.eup %2283  ;;  %v1353_v9 = vadd.f32 1.0, %v2282_v32  ;;  %2309 = vtanh.f32 %v668_v16  ;;  %v1744_v46 = vadd.f32 %v1662_v61, %v1661_v29  ;;  %v2954_v15 = vpop.f32.mrf.mxu1 }
 0x175   :  { %v2286_v19 = vpop.eup %2285  ;;  %2311 = vpow2.f32 %v2018_v1  ;;  %v1663_v49 = vmul.f32 %v2806_v39, %v1575_v36  ;;  %v2974_v47 = vpop.f32.mrf.mxu0  ;;  %v919_v1 = vadd.f32 %v2912_v11, %v2740_v56 }
 0x176   :  { %v2288_v51 = vpop.eup %2287  ;;  %2313 = vrcp.f32 %v1353_v9  ;;  %1745 = vadd.xlane.f32.xlu1 %v1744_v46  ;;  %v1576_v23 = vmul.f32 %v2286_v19, %v2284_v7  ;;  %v2962_v28 = vpop.f32.mrf.mxu1  ;;  %v921_v19 = vadd.f32 %v2918_v17, %v2743_v58 }
 0x177   :  { %v2290_v42 = vpop.eup %2289  ;;  %v1354_v5 = vadd.f32 1.0, %v2288_v51  ;;  %2315 = vtanh.f32 %v670_v18  ;;  %v2022_v18 = vmul.f32 -1.442695, %v915_v21  ;;  %v2023_v36 = vmul.f32 -1.442695, %v919_v1 }
 0x178   :  { %v2292_v14 = vpop.eup %2291  ;;  %2317 = vpow2.f32 %v2019_v54  ;;  %v1664_v34 = vmul.f32 %v2814_v44, %v1576_v23  ;;  %v2968_v53 = vpop.f32.mrf.mxu1 }
 0x179   :  { %v2294_v40 = vpop.eup %2293  ;;  %2319 = vrcp.f32 %v1354_v5  ;;  %v1577_v57 = vmul.f32 %v2292_v14, %v2290_v42  ;;  %v2984_v54 = vpop.f32.mrf.mxu0 }
 0x17a   :  { %v2296_v35 = vpop.eup %2295  ;;  %v1355_v31 = vadd.f32 1.0, %v2294_v40  ;;  %2321 = vtanh.f32 %v672_v38  ;;  %v1747_v16 = vadd.f32 %v1664_v34, %v1663_v49  ;;  %v2976_v55 = vpop.f32.mrf.mxu1 }
 0x17b   :  { %v2298_v52 = vpop.eup %2297  ;;  %2323 = vpow2.f32 %v2020_v10  ;;  %v1665_v7 = vmul.f32 %v2806_v39, %v1577_v57  ;;  %v923_v10 = vadd.f32 %v2924_v26, %v2740_v56  ;;  %v2998_v14 = vpop.f32.mrf.mxu0  ;;  %v925_v57 = vadd.f32 %v2932_v43, %v2743_v58 }
 0x17c   :  { %v2300_v48 = vpop.eup %2299  ;;  %2325 = vrcp.f32 %v1355_v31  ;;  %1748 = vadd.xlane.f32.xlu0 %v1747_v16  ;;  %v1578_v60 = vmul.f32 %v2298_v52, %v2296_v35  ;;  %v2982_v29 = vpop.f32.mrf.mxu1  ;;  %v686_v16 = vadd.f32 %v2898_v27, %v2749_v63  ;;  %v688_v27 = vadd.f32 %v2908_v0, %v2754_v3 }
 0x17d   :  { %v2302_v61 = vpop.eup %2301  ;;  %v1356_v32 = vadd.f32 1.0, %v2300_v48  ;;  %2327 = vtanh.f32 %v676_v4  ;;  %v2025_v45 = vmul.f32 -1.442695, %v923_v10  ;;  %v3010_v52 = vpop.f32.mrf.mxu0  ;;  %v690_v0 = vadd.f32 %v2916_v13, %v2749_v63 }
 0x17e   :  { %v2304_v6 = vpop.eup %2303  ;;  %2329 = vpow2.f32 %v2021_v41  ;;  %v1666_v11 = vmul.f32 %v2814_v44, %v1578_v60  ;;  %v2988_v9 = vpop.f32.mrf.mxu1  ;;  %v2024_v41 = vmul.f32 -1.442695, %v921_v19  ;;  %v692_v13 = vadd.f32 %v2920_v2, %v2754_v3 }
 0x17f   :  { %v2306_v46 = vpop.eup %2305  ;;  %2331 = vrcp.f32 %v1356_v32  ;;  %v1579_v23 = vmul.f32 %v2304_v6, %v2302_v61 }
 0x180   :  { %v2308_v20 = vpop.eup %2307  ;;  %v1357_v51 = vadd.f32 1.0, %v2306_v46  ;;  %2333 = vtanh.f32 %v678_v12  ;;  %v1750_v38 = vadd.f32 %v1666_v11, %v1665_v7  ;;  %v2994_v42 = vpop.f32.mrf.mxu1  ;;  %v2026_v46 = vmul.f32 -1.442695, %v925_v57 }
 0x181   :  { %v2310_v5 = vpop.eup %2309  ;;  %2335 = vpow2.f32 %v2022_v18  ;;  %v1667_v35 = vmul.f32 %v2806_v39, %v1579_v23  ;;  %v929_v18 = vadd.f32 %v2940_v50, %v2740_v56  ;;  %v931_v23 = vadd.f32 %v2946_v62, %v2743_v58 }
 0x182   :  { %v2312_v49 = vpop.eup %2311  ;;  %2337 = vrcp.f32 %v1357_v51  ;;  %1751 = vadd.xlane.f32.xlu1 %v1750_v38  ;;  %v1580_v17 = vmul.f32 %v2310_v5, %v2308_v20  ;;  %v3002_v34 = vpop.f32.mrf.mxu1 }
 0x183   :  { %v2314_v40 = vpop.eup %2313  ;;  %v1358_v4 = vadd.f32 1.0, %v2312_v49  ;;  %2339 = vtanh.f32 %v680_v24  ;;  %v3018_v24 = vpop.f32.mrf.mxu0  ;;  %v2027_v38 = vmul.f32 -1.442695, %v929_v18 }
 0x184   :  { %v2316_v21 = vpop.eup %2315  ;;  %2341 = vpow2.f32 %v2023_v36  ;;  %v1668_v26 = vmul.f32 %v2814_v44, %v1580_v17  ;;  %v3012_v61 = vpop.f32.mrf.mxu1 }
 0x185   :  { %v2318_v31 = vpop.eup %2317  ;;  %2343 = vrcp.f32 %v1358_v4  ;;  %v1581_v60 = vmul.f32 %v2316_v21, %v2314_v40  ;;  %v933_v40 = vadd.f32 %v2954_v15, %v2740_v56  ;;  %v3030_v4 = vpop.f32.mrf.mxu0 }
 0x186   :  { %v2320_v1 = vpop.eup %2319  ;;  %v1359_v48 = vadd.f32 1.0, %v2318_v31  ;;  %2345 = vtanh.f32 %v682_v33  ;;  %v1753_v12 = vadd.f32 %v1668_v26, %v1667_v35  ;;  %v3022_v50 = vpop.f32.mrf.mxu1  ;;  %v2028_v31 = vmul.f32 -1.442695, %v931_v23 }
 0x187   :  { %v2322_v32 = vpop.eup %2321  ;;  %2347 = vpow2.f32 %v2024_v41  ;;  %v1669_v19 = vmul.f32 %v2806_v39, %v1581_v60  ;;  %v2029_v2 = vmul.f32 -1.442695, %v933_v40 }
 0x188   :  { %v2324_v6 = vpop.eup %2323  ;;  %2349 = vrcp.f32 %v1359_v48  ;;  %1754 = vadd.xlane.f32.xlu0 %v1753_v12  ;;  %v1582_v43 = vmul.f32 %v2322_v32, %v2320_v1  ;;  %v3034_v62 = vpop.f32.mrf.mxu1  ;;  %v696_v1 = vadd.f32 %v2930_v37, %v2749_v63  ;;  %v935_v48 = vadd.f32 %v2962_v28, %v2743_v58 }
 0x189   :  { %v2326_v7 = vpop.eup %2325  ;;  %v1360_v11 = vadd.f32 1.0, %v2324_v6  ;;  %2351 = vtanh.f32 %v686_v16  ;;  %v3042_v12 = vpop.f32.mrf.mxu0  ;;  %v698_v37 = vadd.f32 %v2936_v25, %v2754_v3  ;;  %v700_v25 = vadd.f32 %v2942_v59, %v2749_v63 }
 0x18a   :  { %v2328_v36 = vpop.eup %2327  ;;  %2353 = vpow2.f32 %v2025_v45  ;;  %v1670_v20 = vmul.f32 %v2814_v44, %v1582_v43  ;;  %v702_v59 = vadd.f32 %v2952_v8, %v2754_v3 }
 0x18b   :  { %v2330_v51 = vpop.eup %2329  ;;  %2355 = vrcp.f32 %v1360_v11  ;;  %v1583_v33 = vmul.f32 %v2328_v36, %v2326_v7  ;;  %v939_v7 = vadd.f32 %v2968_v53, %v2740_v56 }
 0x18c   :  { %v2332_v5 = vpop.eup %2331  ;;  %v1361_v10 = vadd.f32 1.0, %v2330_v51  ;;  %2357 = vtanh.f32 %v688_v27  ;;  %v1756_v49 = vadd.f32 %v1670_v20, %v1669_v19  ;;  %v3044_v27 = vpop.f32.mrf.mxu1  ;;  %v2030_v19 = vmul.f32 -1.442695, %v935_v48 }
 0x18d   :  { %v2334_v17 = vpop.eup %2333  ;;  %2359 = vpow2.f32 %v2026_v46  ;;  %v1671_v45 = vmul.f32 %v2806_v39, %v1583_v33  ;;  %v3050_v20 = vpop.f32.mrf.mxu0  ;;  %v945_v48 = vadd.f32 %v2988_v9, %v2743_v58 }
 0x18e   :  { %v2336_v41 = vpop.eup %2335  ;;  %2361 = vrcp.f32 %v1361_v10  ;;  %1757 = vadd.xlane.f32.xlu1 %v1756_v49  ;;  %v1584_v21 = vmul.f32 %v2334_v17, %v2332_v5  ;;  %v3054_v53 = vpop.f32.mrf.mxu1  ;;  %v2031_v5 = vmul.f32 -1.442695, %v939_v7  ;;  %v941_v10 = vadd.f32 %v2976_v55, %v2743_v58 }
 0x18f   :  { %v2338_v35 = vpop.eup %2337  ;;  %v1362_v26 = vadd.f32 1.0, %v2336_v41  ;;  %2363 = vtanh.f32 %v690_v0 }
 0x190   :  { %v2340_v16 = vpop.eup %2339  ;;  %2365 = vpow2.f32 %v2027_v38  ;;  %v1672_v15 = vmul.f32 %v2814_v44, %v1584_v21  ;;  %v3062_v21 = vpop.f32.mrf.mxu0 }
 0x191   :  { %v2342_v57 = vpop.eup %2341  ;;  %2367 = vrcp.f32 %v1362_v26  ;;  %v1585_v6 = vmul.f32 %v2340_v16, %v2338_v35  ;;  %v3066_v55 = vpop.f32.mrf.mxu1 }
 0x192   :  { %v2344_v60 = vpop.eup %2343  ;;  %v1363_v32 = vadd.f32 1.0, %v2342_v57  ;;  %2369 = vtanh.f32 %v692_v13  ;;  %v1759_v18 = vadd.f32 %v1672_v15, %v1671_v45  ;;  %v943_v13 = vadd.f32 %v2982_v29, %v2740_v56 }
 0x193   :  { %v2346_v43 = vpop.eup %2345  ;;  %2371 = vpow2.f32 %v2028_v31  ;;  %v1673_v0 = vmul.f32 %v2806_v39, %v1585_v6  ;;  %v2032_v45 = vmul.f32 -1.442695, %v941_v10  ;;  %v3076_v7 = vpop.f32.mrf.mxu1  ;;  %v951_v10 = vadd.f32 %v3002_v34, %v2743_v58 }
 0x194   :  { %v2348_v11 = vpop.eup %2347  ;;  %2373 = vrcp.f32 %v1363_v32  ;;  %1760 = vadd.xlane.f32.xlu0 %v1759_v18  ;;  %v1586_v28 = vmul.f32 %v2346_v43, %v2344_v60  ;;  %v2033_v8 = vmul.f32 -1.442695, %v943_v13  ;;  %v3074_v60 = vpop.f32.mrf.mxu0  ;;  %v953_v13 = vadd.f32 %v3012_v61, %v2740_v56 }
 0x195   :  { %v2350_v46 = vpop.eup %2349  ;;  %v1364_v36 = vadd.f32 1.0, %v2348_v11  ;;  %2375 = vtanh.f32 %v696_v1 }
 0x196   :  { %v2352_v51 = vpop.eup %2351  ;;  %2377 = vpow2.f32 %v2029_v2  ;;  %v1674_v38 = vmul.f32 %v2814_v44, %v1586_v28  ;;  %v706_v2 = vadd.f32 %v2958_v22, %v2749_v63  ;;  %v708_v22 = vadd.f32 %v2964_v30, %v2754_v3 }
 0x197   :  { %v2354_v23 = vpop.eup %2353  ;;  %2379 = vrcp.f32 %v1364_v36  ;;  %v1587_v40 = vmul.f32 %v2352_v51, %v2350_v46  ;;  %v3082_v51 = vpop.f32.mrf.mxu0  ;;  %v710_v30 = vadd.f32 %v2974_v47, %v2749_v63  ;;  %v712_v47 = vadd.f32 %v2984_v54, %v2754_v3 }
 0x198   :  { %v2356_v49 = vpop.eup %2355  ;;  %v1365_v33 = vadd.f32 1.0, %v2354_v23  ;;  %2381 = vtanh.f32 %v698_v37  ;;  %v1762_v17 = vadd.f32 %v1674_v38, %v1673_v0  ;;  %v949_v37 = vadd.f32 %v2994_v42, %v2740_v56  ;;  %v3086_v42 = vpop.f32.mrf.mxu1 }
 0x199   :  { %v2358_v41 = vpop.eup %2357  ;;  %2383 = vpow2.f32 %v2030_v19  ;;  %v1675_v57 = vmul.f32 %v2806_v39, %v1587_v40  ;;  %v2034_v19 = vmul.f32 -1.442695, %v945_v48  ;;  %v2037_v54 = vmul.f32 -1.442695, %v953_v13 }
 0x19a   :  { %v2360_v35 = vpop.eup %2359  ;;  %2385 = vrcp.f32 %v1365_v33  ;;  %1763 = vadd.xlane.f32.xlu1 %v1762_v17  ;;  %v1588_v26 = vmul.f32 %v2358_v41, %v2356_v49  ;;  %v3098_v34 = vpop.f32.mrf.mxu1 }
 0x19b   :  { %v2362_v31 = vpop.eup %2361  ;;  %v1366_v16 = vadd.f32 1.0, %v2360_v35  ;;  %2387 = vtanh.f32 %v700_v25  ;;  %v3094_v35 = vpop.f32.mrf.mxu0 }
 0x19c   :  { %v2364_v15 = vpop.eup %2363  ;;  %2389 = vpow2.f32 %v2031_v5  ;;  %v1676_v29 = vmul.f32 %v2814_v44, %v1588_v26  ;;  %v2035_v5 = vmul.f32 -1.442695, %v949_v37  ;;  %v959_v37 = vadd.f32 %v3034_v62, %v2740_v56 }
 0x19d   :  { %v2366_v1 = vpop.eup %2365  ;;  %2391 = vrcp.f32 %v1366_v16  ;;  %v1589_v43 = vmul.f32 %v2364_v15, %v2362_v31 }
 0x19e   :  { %v2368_v32 = vpop.eup %2367  ;;  %v1367_v18 = vadd.f32 1.0, %v2366_v1  ;;  %2393 = vtanh.f32 %v702_v59  ;;  %v1765_v6 = vadd.f32 %v1676_v29, %v1675_v57  ;;  %v716_v1 = vadd.f32 %v2998_v14, %v2749_v63 }
 0x19f   :  { %v2370_v11 = vpop.eup %2369  ;;  %2395 = vpow2.f32 %v2032_v45  ;;  %v1677_v38 = vmul.f32 %v2806_v39, %v1589_v43  ;;  %v2036_v45 = vmul.f32 -1.442695, %v951_v10  ;;  %v718_v14 = vadd.f32 %v3010_v52, %v2754_v3 }
 0x1a0   :  { %v2372_v28 = vpop.eup %2371  ;;  %2397 = vrcp.f32 %v1367_v18  ;;  %1766 = vadd.xlane.f32.xlu0 %v1765_v6  ;;  %v1590_v9 = vmul.f32 %v2370_v11, %v2368_v32  ;;  %v3108_v6 = vpop.f32.mrf.mxu1  ;;  %v720_v52 = vadd.f32 %v3018_v24, %v2749_v63  ;;  %v722_v24 = vadd.f32 %v3030_v4, %v2754_v3 }
 0x1a1   :  { %v2374_v46 = vpop.eup %2373  ;;  %v1368_v36 = vadd.f32 1.0, %v2372_v28  ;;  %2399 = vtanh.f32 %v706_v2  ;;  %v955_v2 = vadd.f32 %v3022_v50, %v2743_v58 }
 0x1a2   :  { %v2376_v0 = vpop.eup %2375  ;;  %2401 = vpow2.f32 %v2033_v8  ;;  %v1678_v23 = vmul.f32 %v2814_v44, %v1590_v9  ;;  %v3106_v8 = vpop.f32.mrf.mxu0 }
 0x1a3   :  { %v2378_v25 = vpop.eup %2377  ;;  %2403 = vrcp.f32 %v1368_v36  ;;  %v1591_v40 = vmul.f32 %v2376_v0, %v2374_v46  ;;  %v2038_v46 = vmul.f32 -1.442695, %v955_v2  ;;  %v3118_v62 = vpop.f32.mrf.mxu1 }
 0x1a4   :  { %v2380_v49 = vpop.eup %2379  ;;  %v1369_v33 = vadd.f32 1.0, %v2378_v25  ;;  %2405 = vtanh.f32 %v708_v22  ;;  %v1768_v17 = vadd.f32 %v1678_v23, %v1677_v38  ;;  %v3114_v36 = vpop.f32.mrf.mxu0  ;;  %v2039_v25 = vmul.f32 -1.442695, %v959_v37 }
 0x1a5   :  { %v2382_v41 = vpop.eup %2381  ;;  %2407 = vpow2.f32 %v2034_v19  ;;  %v1679_v57 = vmul.f32 %v2806_v39, %v1591_v40  ;;  %v963_v40 = vadd.f32 %v3054_v53, %v2740_v56 }
 0x1a6   :  { %v2384_v59 = vpop.eup %2383  ;;  %2409 = vrcp.f32 %v1369_v33  ;;  %1769 = vadd.xlane.f32.xlu1 %v1768_v17  ;;  %v1592_v26 = vmul.f32 %v2382_v41, %v2380_v49  ;;  %v3126_v41 = vpop.f32.mrf.mxu0 }
 0x1a7   :  { %v2386_v31 = vpop.eup %2385  ;;  %v1370_v16 = vadd.f32 1.0, %v2384_v59  ;;  %2411 = vtanh.f32 %v710_v30  ;;  %v961_v30 = vadd.f32 %v3044_v27, %v2743_v58  ;;  %v3130_v59 = vpop.f32.mrf.mxu1  ;;  %v2041_v4 = vmul.f32 -1.442695, %v963_v40 }
 0x1a8   :  { %v2388_v15 = vpop.eup %2387  ;;  %2413 = vpow2.f32 %v2035_v5  ;;  %v1680_v61 = vmul.f32 %v2814_v44, %v1592_v26 }
 0x1a9   :  { %v2390_v29 = vpop.eup %2389  ;;  %2415 = vrcp.f32 %v1370_v16  ;;  %v1593_v43 = vmul.f32 %v2388_v15, %v2386_v31  ;;  %v2040_v31 = vmul.f32 -1.442695, %v961_v30 }
 0x1aa   :  { %v2392_v48 = vpop.eup %2391  ;;  %v1371_v32 = vadd.f32 1.0, %v2390_v29  ;;  %2417 = vtanh.f32 %v712_v47  ;;  %v1771_v18 = vadd.f32 %v1680_v61, %v1679_v57  ;;  %v726_v57 = vadd.f32 %v3042_v12, %v2749_v63  ;;  %v3138_v29 = vpop.f32.mrf.mxu0 }
 0x1ab   :  { %v2394_v11 = vpop.eup %2393  ;;  %2419 = vpow2.f32 %v2036_v45  ;;  %v1681_v0 = vmul.f32 %v2806_v39, %v1593_v43  ;;  %v965_v61 = vadd.f32 %v3066_v55, %v2743_v58  ;;  %v969_v43 = vadd.f32 %v3076_v7, %v2740_v56 }
 0x1ac   :  { %v2396_v28 = vpop.eup %2395  ;;  %2421 = vrcp.f32 %v1371_v32  ;;  %1772 = vadd.xlane.f32.xlu0 %v1771_v18  ;;  %v1594_v50 = vmul.f32 %v2394_v11, %v2392_v48  ;;  %v3140_v48 = vpop.f32.mrf.mxu1  ;;  %v728_v12 = vadd.f32 %v3050_v20, %v2754_v3  ;;  %v730_v20 = vadd.f32 %v3062_v21, %v2749_v63 }
 0x1ad   :  { %v2398_v22 = vpop.eup %2397  ;;  %v1372_v9 = vadd.f32 1.0, %v2396_v28  ;;  %2423 = vtanh.f32 %v716_v1  ;;  %v732_v21 = vadd.f32 %v3074_v60, %v2754_v3 }
 0x1ae   :  { %v2400_v19 = vpop.eup %2399  ;;  %2425 = vpow2.f32 %v2037_v54  ;;  %v1682_v38 = vmul.f32 %v2814_v44, %v1594_v50  ;;  %v3146_v50 = vpop.f32.mrf.mxu0 }
 0x1af   :  { %v2402_v23 = vpop.eup %2401  ;;  %2427 = vrcp.f32 %v1372_v9  ;;  %v1595_v33 = vmul.f32 %v2400_v19, %v2398_v22  ;;  %v3148_v9 = vpop.f32.mrf.mxu1 }
 0x1b0   :  { %v2404_v5 = vpop.eup %2403  ;;  %v1373_v10 = vadd.f32 1.0, %v2402_v23  ;;  %2429 = vtanh.f32 %v718_v14  ;;  %v1774_v49 = vadd.f32 %v1682_v38, %v1681_v0  ;;  %v2042_v14 = vmul.f32 -1.442695, %v965_v61 }
 0x1b1   :  { %v2406_v17 = vpop.eup %2405  ;;  %2431 = vpow2.f32 %v2038_v46  ;;  %v1683_v45 = vmul.f32 %v2806_v39, %v1595_v33  ;;  %v2043_v0 = vmul.f32 -1.442695, %v969_v43  ;;  %v971_v38 = vadd.f32 %v3086_v42, %v2743_v58 }
 0x1b2   :  { %v2408_v13 = vpop.eup %2407  ;;  %2433 = vrcp.f32 %v1373_v10  ;;  %1775 = vadd.xlane.f32.xlu1 %v1774_v49  ;;  %v1596_v27 = vmul.f32 %v2406_v17, %v2404_v5  ;;  %v973_v10 = vadd.f32 %v3098_v34, %v2740_v56  ;;  %v3158_v49 = vpop.f32.mrf.mxu0 }
 0x1b3   :  { %v2410_v47 = vpop.eup %2409  ;;  %v1374_v26 = vadd.f32 1.0, %v2408_v13  ;;  %2435 = vtanh.f32 %v720_v52  ;;  %v3162_v17 = vpop.f32.mrf.mxu1 }
 0x1b4   :  { %v2412_v16 = vpop.eup %2411  ;;  %2437 = vpow2.f32 %v2039_v25  ;;  %v1684_v53 = vmul.f32 %v2814_v44, %v1596_v27  ;;  %v2045_v60 = vmul.f32 -1.442695, %v973_v10 }
 0x1b5   :  { %v2414_v15 = vpop.eup %2413  ;;  %2439 = vrcp.f32 %v1374_v26  ;;  %v1597_v32 = vmul.f32 %v2412_v16, %v2410_v47  ;;  %v975_v16 = vadd.f32 %v3108_v6, %v2743_v58 }
 0x1b6   :  { %v2416_v1 = vpop.eup %2415  ;;  %v1375_v54 = vadd.f32 1.0, %v2414_v15  ;;  %2441 = vtanh.f32 %v722_v24  ;;  %v1777_v2 = vadd.f32 %v1684_v53, %v1683_v45  ;;  %v2044_v24 = vmul.f32 -1.442695, %v971_v38  ;;  %v3170_v45 = vpop.f32.mrf.mxu0 }
 0x1b7   :  { %v2418_v18 = vpop.eup %2417  ;;  %2443 = vpow2.f32 %v2040_v31  ;;  %v1685_v46 = vmul.f32 %v2806_v39, %v1597_v32  ;;  %v736_v31 = vadd.f32 %v3082_v51, %v2749_v63  ;;  %v738_v51 = vadd.f32 %v3094_v35, %v2754_v3 }
 0x1b8   :  { %v2420_v11 = vpop.eup %2419  ;;  %2445 = vrcp.f32 %v1375_v54  ;;  %1778 = vadd.xlane.f32.xlu0 %v1777_v2  ;;  %v1598_v55 = vmul.f32 %v2418_v18, %v2416_v1  ;;  %v979_v54 = vadd.f32 %v3118_v62, %v2740_v56  ;;  %v2046_v43 = vmul.f32 -1.442695, %v975_v16 }
 0x1b9   :  { %v2422_v37 = vpop.eup %2421  ;;  %v1376_v28 = vadd.f32 1.0, %v2420_v11  ;;  %2447 = vtanh.f32 %v726_v57  ;;  %v3172_v57 = vpop.f32.mrf.mxu1  ;;  %v740_v35 = vadd.f32 %v3106_v8, %v2749_v63  ;;  %v983_v38 = vadd.f32 %v3140_v48, %v2740_v56 }
 0x1ba   :  { %v2424_v22 = vpop.eup %2423  ;;  %2449 = vpow2.f32 %v2041_v4  ;;  %v1686_v7 = vmul.f32 %v2814_v44, %v1598_v55  ;;  %v3178_v11 = vpop.f32.mrf.mxu0  ;;  %v742_v8 = vadd.f32 %v3114_v36, %v2754_v3  ;;  %v989_v16 = vadd.f32 %v3162_v17, %v2740_v56 }
 0x1bb   :  { %v2426_v19 = vpop.eup %2425  ;;  %2451 = vrcp.f32 %v1376_v28  ;;  %v1599_v30 = vmul.f32 %v2424_v22, %v2422_v37  ;;  %v3180_v55 = vpop.f32.mrf.mxu1  ;;  %v981_v22 = vadd.f32 %v3130_v59, %v2743_v58  ;;  %v2049_v36 = vmul.f32 -1.442695, %v983_v38 }
 0x1bc   :  { %v2428_v23 = vpop.eup %2427  ;;  %v1377_v52 = vadd.f32 1.0, %v2426_v19  ;;  %2453 = vtanh.f32 %v728_v12  ;;  %v1780_v25 = vadd.f32 %v1686_v7, %v1685_v46 }
 0x1bd   :  { %v2430_v5 = vpop.eup %2429  ;;  %2455 = vpow2.f32 %v2042_v14  ;;  %v1687_v47 = vmul.f32 %v2806_v39, %v1599_v30  ;;  %v2047_v14 = vmul.f32 -1.442695, %v979_v54  ;;  %v2048_v10 = vmul.f32 -1.442695, %v981_v22 }
 0x1be   :  { %v2432_v33 = vpop.eup %2431  ;;  %2457 = vrcp.f32 %v1377_v52  ;;  %1781 = vadd.xlane.f32.xlu1 %v1780_v25  ;;  %v1600_v42 = vmul.f32 %v2430_v5, %v2428_v23  ;;  %v3190_v23 = vpop.f32.mrf.mxu0 }
 0x1bf   :  { %v2434_v40 = vpop.eup %2433  ;;  %v1378_v13 = vadd.f32 1.0, %v2432_v33  ;;  %2459 = vtanh.f32 %v730_v20  ;;  %v3194_v25 = vpop.f32.mrf.mxu1 }
 0x1c0   :  { %v2436_v27 = vpop.eup %2435  ;;  %2461 = vpow2.f32 %v2043_v0  ;;  %v1688_v34 = vmul.f32 %v2814_v44, %v1600_v42 }
 0x1c1   :  { %v2438_v26 = vpop.eup %2437  ;;  %2463 = vrcp.f32 %v1378_v13  ;;  %v1601_v61 = vmul.f32 %v2436_v27, %v2434_v40  ;;  %v746_v40 = vadd.f32 %v3126_v41, %v2749_v63  ;;  %v985_v13 = vadd.f32 %v3148_v9, %v2743_v58 }
 0x1c2   :  { %v2440_v53 = vpop.eup %2439  ;;  %v1379_v15 = vadd.f32 1.0, %v2438_v26  ;;  %2465 = vtanh.f32 %v732_v21  ;;  %v1783_v4 = vadd.f32 %v1688_v34, %v1687_v47  ;;  %v3204_v34 = vpop.f32.mrf.mxu1  ;;  %v748_v41 = vadd.f32 %v3138_v29, %v2754_v3 }
 0x1c3   :  { %v2442_v1 = vpop.eup %2441  ;;  %2467 = vpow2.f32 %v2044_v24  ;;  %v1689_v37 = vmul.f32 %v2806_v39, %v1601_v61  ;;  %v3202_v24 = vpop.f32.mrf.mxu0  ;;  %v2050_v61 = vmul.f32 -1.442695, %v985_v13  ;;  %v750_v29 = vadd.f32 %v3146_v50, %v2749_v63 }
 0x1c4   :  { %v2444_v2 = vpop.eup %2443  ;;  %2469 = vrcp.f32 %v1379_v15  ;;  %1784 = vadd.xlane.f32.xlu0 %v1783_v4  ;;  %v1602_v6 = vmul.f32 %v2442_v1, %v2440_v53  ;;  %v752_v50 = vadd.f32 %v3158_v49, %v2754_v3  ;;  %v995_v49 = vadd.f32 %v3194_v25, %v2743_v58 }
 0x1c5   :  { %v2446_v32 = vpop.eup %2445  ;;  %v1380_v18 = vadd.f32 1.0, %v2444_v2  ;;  %2471 = vtanh.f32 %v736_v31  ;;  %v3210_v1 = vpop.f32.mrf.mxu0  ;;  %v758_v25 = vadd.f32 %v3178_v11, %v2754_v3 }
 0x1c6   :  { %v2448_v12 = vpop.eup %2447  ;;  %2473 = vpow2.f32 %v2045_v60  ;;  %v1690_v62 = vmul.f32 %v2814_v44, %v1602_v6  ;;  %v3212_v2 = vpop.f32.mrf.mxu1 }
 0x1c7   :  { %v2450_v28 = vpop.eup %2449  ;;  %2475 = vrcp.f32 %v1380_v18  ;;  %v1603_v20 = vmul.f32 %v2448_v12, %v2446_v32  ;;  %v2051_v32 = vmul.f32 -1.442695, %v989_v16  ;;  %v991_v18 = vadd.f32 %v3172_v57, %v2743_v58 }
 0x1c8   :  { %v2452_v46 = vpop.eup %2451  ;;  %v1381_v7 = vadd.f32 1.0, %v2450_v28  ;;  %2477 = vtanh.f32 %v738_v51  ;;  %v1786_v19 = vadd.f32 %v1690_v62, %v1689_v37 }
 0x1c9   :  { %v2454_v0 = vpop.eup %2453  ;;  %2479 = vpow2.f32 %v2046_v43  ;;  %v1691_v21 = vmul.f32 %v2806_v39, %v1603_v20  ;;  %v2052_v20 = vmul.f32 -1.442695, %v991_v18 }
 0x1ca   :  { %v2456_v52 = vpop.eup %2455  ;;  %2481 = vrcp.f32 %v1381_v7  ;;  %1787 = vadd.xlane.f32.xlu1 %v1786_v19  ;;  %v1604_v59 = vmul.f32 %v2454_v0, %v2452_v46  ;;  %v1002_v46 = vpop.f32.mrf.mxu1 }
 0x1cb   :  { %v2458_v30 = vpop.eup %2457  ;;  %v1382_v5 = vadd.f32 1.0, %v2456_v52  ;;  %2483 = vtanh.f32 %v740_v35  ;;  %v993_v35 = vadd.f32 %v3180_v55, %v2740_v56 }
 0x1cc   :  { %v2460_v33 = vpop.eup %2459  ;;  %2485 = vpow2.f32 %v2047_v14  ;;  %v1692_v48 = vmul.f32 %v2814_v44, %v1604_v59  ;;  %v3222_v14 = vpop.f32.mrf.mxu0 }
 0x1cd   :  { %v2462_v42 = vpop.eup %2461  ;;  %2487 = vrcp.f32 %v1382_v5  ;;  %v1605_v31 = vmul.f32 %v2460_v33, %v2458_v30  ;;  %v2053_v59 = vmul.f32 -1.442695, %v993_v35  ;;  %v1004_v33 = vpop.f32.mrf.mxu1 }
 0x1ce   :  { %v2464_v27 = vpop.eup %2463  ;;  %v1383_v47 = vadd.f32 1.0, %v2462_v42  ;;  %2489 = vtanh.f32 %v742_v8  ;;  %v1789_v26 = vadd.f32 %v1692_v48, %v1691_v21  ;;  %v756_v8 = vadd.f32 %v3170_v45, %v2749_v63  ;;  %v3232_v30 = vpop.f32.mrf.mxu0  ;;  %v3234_v42 = vld [vmem:[#allocation2] ss:$0 sm:$0xff] }
 0x1cf   :  { %v2466_v60 = vpop.eup %2465  ;;  %2491 = vpow2.f32 %v2048_v10  ;;  %v1693_v51 = vmul.f32 %v2806_v39, %v1605_v31  ;;  %v2054_v31 = vmul.f32 -1.442695, %v995_v49 }
 0x1d0   :  { %v2468_v53 = vpop.eup %2467  ;;  %2493 = vrcp.f32 %v1383_v47  ;;  %1790 = vadd.xlane.f32.xlu0 %v1789_v26  ;;  %v1606_v9 = vmul.f32 %v2466_v60, %v2464_v27  ;;  %v3240_v60 = vpop.f32.mrf.mxu0 }
 0x1d1   :  { %v2470_v15 = vpop.eup %2469  ;;  %v1384_v4 = vadd.f32 1.0, %v2468_v53  ;;  %2495 = vtanh.f32 %v746_v40 }
 0x1d2   :  { %v2472_v54 = vpop.eup %2471  ;;  %2497 = vpow2.f32 %v2049_v36  ;;  %v1694_v17 = vmul.f32 %v2814_v44, %v1606_v9  ;;  %v999_v36 = vadd.f32 %v3204_v34, %v2740_v56  ;;  %v1008_v34 = vpop.f32.mrf.mxu1 }
 0x1d3   :  { %v2474_v6 = vpop.eup %2473  ;;  %2499 = vrcp.f32 %v1384_v4  ;;  %v1607_v62 = vmul.f32 %v2472_v54, %v2470_v15  ;;  %v760_v15 = vadd.f32 %v3190_v23, %v2749_v63  ;;  %v3254_v18 = vpop.f32.mrf.mxu0 }
 0x1d4   :  { %v2476_v43 = vpop.eup %2475  ;;  %v1385_v12 = vadd.f32 1.0, %v2474_v6  ;;  %2501 = vtanh.f32 %v748_v41  ;;  %v1792_v37 = vadd.f32 %v1694_v17, %v1693_v51  ;;  %v2055_v4 = vmul.f32 -1.442695, %v999_v36 }
 0x1d5   :  { %v2478_v28 = vpop.eup %2477  ;;  %2503 = vpow2.f32 %v2050_v61  ;;  %v1695_v38 = vmul.f32 %v2806_v39, %v1607_v62  ;;  %v1001_v61 = vadd.f32 %v3212_v2, %v2743_v58  ;;  %v762_v2 = vadd.f32 %v3202_v24, %v2754_v3 }
 0x1d6   :  { %v2480_v22 = vpop.eup %2479  ;;  %2505 = vrcp.f32 %v1385_v12  ;;  %1793 = vadd.xlane.f32.xlu1 %v1792_v37  ;;  %v1608_v57 = vmul.f32 %v2478_v28, %v2476_v43  ;;  %v1010_v12 = vpop.f32.mrf.mxu1 }
 0x1d7   :  { %v2482_v7 = vpop.eup %2481  ;;  %v1386_v19 = vadd.f32 1.0, %v2480_v22  ;;  %2507 = vtanh.f32 %v750_v29  ;;  %v2056_v22 = vmul.f32 -1.442695, %v1001_v61 }
 0x1d8   :  { %v2484_v0 = vpop.eup %2483  ;;  %2509 = vpow2.f32 %v2051_v32  ;;  %v1696_v55 = vmul.f32 %v2814_v44, %v1608_v57  ;;  %v1003_v32 = vadd.f32 %v1002_v46, %v2740_v56  ;;  %v766_v46 = vadd.f32 %v3210_v1, %v2749_v63 }
 0x1d9   :  { %v2486_v52 = vpop.eup %2485  ;;  %2511 = vrcp.f32 %v1386_v19  ;;  %v1609_v48 = vmul.f32 %v2484_v0, %v2482_v7  ;;  %v3268_v0 = vpop.f32.mrf.mxu0 }
 0x1da   :  { %v2488_v5 = vpop.eup %2487  ;;  %v1387_v10 = vadd.f32 1.0, %v2486_v52  ;;  %2513 = vtanh.f32 %v752_v50  ;;  %v1795_v21 = vadd.f32 %v1696_v55, %v1695_v38  ;;  %v2057_v19 = vmul.f32 -1.442695, %v1003_v32 }
 0x1db   :  { %v2490_v40 = vpop.eup %2489  ;;  %2515 = vpow2.f32 %v2052_v20  ;;  %v1697_v41 = vmul.f32 %v2806_v39, %v1609_v48  ;;  %v1005_v20 = vadd.f32 %v1004_v33, %v2743_v58  ;;  %v768_v33 = vadd.f32 %v3222_v14, %v2754_v3 }
 0x1dc   :  { %v2492_v45 = vpop.eup %2491  ;;  %2517 = vrcp.f32 %v1387_v10  ;;  %1796 = vadd.xlane.f32.xlu0 %v1795_v21  ;;  %v1610_v13 = vmul.f32 %v2490_v40, %v2488_v5  ;;  %v1725_v27 = vpop.xlane.xlu0 %1724  ;;  %v1009_v10 = vadd.f32 %v1008_v34, %v2740_v56 }
 0x1dd   :  { %v2494_v47 = vpop.eup %2493  ;;  %v1388_v26 = vadd.f32 1.0, %v2492_v45  ;;  %2519 = vtanh.f32 %v756_v8  ;;  %v1844_v16 = vadd.f32 %v3234_v42, %v1725_v27  ;;  %v1012_v8 = vpop.f32.mrf.mxu1  ;;  %v2058_v45 = vmul.f32 -1.442695, %v1005_v20 }
 0x1de   :  { %v2496_v53 = vpop.eup %2495  ;;  %2521 = vpow2.f32 %v2053_v59  ;;  %v1698_v9 = vmul.f32 %v2814_v44, %v1610_v13  ;;  %v2059_v34 = vmul.f32 -1.442695, %v1009_v10 }
 0x1df   :  { %v2498_v11 = vpop.eup %2497  ;;  %2523 = vrcp.f32 %v1388_v26  ;;  %1883 = vst.msk [vmem:[%s3511_s5] sm:$0xff] %vm1882_vm0, %v1844_v16  ;;  %v1611_v6 = vmul.f32 %v2496_v53, %v2494_v47  ;;  %v1014_v47 = vpop.f32.mrf.mxu1  ;;  %v770_v53 = vadd.f32 %v3232_v30, %v2749_v63 }
 0x1e0   :  { %v2500_v54 = vpop.eup %2499  ;;  %v1389_v51 = vadd.f32 1.0, %v2498_v11  ;;  %2525 = vtanh.f32 %v758_v25  ;;  %v1798_v17 = vadd.f32 %v1698_v9, %v1697_v41  ;;  %v1728_v23 = vpop.xlane.xlu0 %1727  ;;  %v1011_v41 = vadd.f32 %v1010_v12, %v2743_v58 }
 0x1e1   :  { %v2502_v29 = vpop.eup %2501  ;;  %2527 = vpow2.f32 %v2054_v31  ;;  %v1845_v62 = vadd.f32 %v3234_v42, %v1728_v23  ;;  %v1699_v57 = vmul.f32 %v2806_v39, %v1611_v6  ;;  %v3278_v25 = vpop.f32.mrf.mxu0  ;;  %v772_v6 = vadd.f32 %v3240_v60, %v2754_v3 }
 0x1e2   :  { %v2504_v43 = vpop.eup %2503  ;;  %2529 = vrcp.f32 %v1389_v51  ;;  %1799 = vadd.xlane.f32.xlu1 %v1798_v17  ;;  %v1612_v37 = vmul.f32 %v2502_v29, %v2500_v54  ;;  %v1013_v54 = vadd.f32 %v1012_v8, %v2740_v56  ;;  %v1018_v29 = vpop.f32.mrf.mxu1  ;;  %v2060_v12 = vmul.f32 -1.442695, %v1011_v41 }
 0x1e3   :  { %v2506_v28 = vpop.eup %2505  ;;  %v1390_v35 = vadd.f32 1.0, %v2504_v43  ;;  %2531 = vtanh.f32 %v760_v15  ;;  %1884 = vst.msk [vmem:[%s3511_s5 + $0x8] sm:$0xff] %vm1882_vm0, %v1845_v62  ;;  %v3291_v51 = vpop.f32.mrf.mxu0 }
 0x1e4   :  { %v2508_v50 = vpop.eup %2507  ;;  %2533 = vpow2.f32 %v2055_v4  ;;  %v1700_v7 = vmul.f32 %v2814_v44, %v1612_v37  ;;  %v1731_v55 = vpop.xlane.xlu1 %1730 }
 0x1e5   :  { %v2510_v24 = vpop.eup %2509  ;;  %2535 = vrcp.f32 %v1390_v35  ;;  %v1613_v38 = vmul.f32 %v2508_v50, %v2506_v28  ;;  %v1846_v49 = vadd.f32 %v3234_v42, %v1731_v55  ;;  %v776_v35 = vadd.f32 %v3254_v18, %v2749_v63 }
 0x1e6   :  { %v2512_v52 = vpop.eup %2511  ;;  %v1391_v1 = vadd.f32 1.0, %v2510_v24  ;;  %2537 = vtanh.f32 %v762_v2  ;;  %v1801_v59 = vadd.f32 %v1700_v7, %v1699_v57  ;;  %v1015_v50 = vadd.f32 %v1014_v47, %v2743_v58  ;;  %v1020_v24 = vpop.f32.mrf.mxu1 }
 0x1e7   :  { %v2514_v5 = vpop.eup %2513  ;;  %2539 = vpow2.f32 %v2056_v22  ;;  %1885 = vst.msk [vmem:[%s3511_s5 + $0x10] sm:$0xff] %vm1882_vm0, %v1846_v49  ;;  %v1701_v26 = vmul.f32 %v2806_v39, %v1613_v38  ;;  %v2061_v22 = vmul.f32 -1.442695, %v1013_v54  ;;  %v1019_v55 = vadd.f32 %v1018_v29, %v2740_v56 }
 0x1e8   :  { %v2516_v21 = vpop.eup %2515  ;;  %2541 = vrcp.f32 %v1391_v1  ;;  %1802 = vadd.xlane.f32.xlu0 %v1801_v59  ;;  %v1614_v48 = vmul.f32 %v2514_v5, %v2512_v52  ;;  %v1734_v13 = vpop.xlane.xlu1 %1733  ;;  %v778_v1 = vadd.f32 %v3268_v0, %v2754_v3  ;;  %v2062_v5 = vmul.f32 -1.442695, %v1015_v50 }
 0x1e9   :  { %v2518_v40 = vpop.eup %2517  ;;  %v1392_v36 = vadd.f32 1.0, %v2516_v21  ;;  %2543 = vtanh.f32 %v766_v46  ;;  %v1847_v31 = vadd.f32 %v3234_v42, %v1734_v13  ;;  %v785_v46 = vpop.f32.mrf.mxu0  ;;  %v780_v0 = vadd.f32 %v3278_v25, %v2749_v63 }
 0x1ea   :  { %v2520_v27 = vpop.eup %2519  ;;  %2545 = vpow2.f32 %v2057_v19  ;;  %v1702_v14 = vmul.f32 %v2814_v44, %v1614_v48  ;;  %v1022_v48 = vpop.f32.mrf.mxu1  ;;  %v2063_v13 = vmul.f32 -1.442695, %v1019_v55  ;;  %v786_v29 = vadd.f32 %v785_v46, %v2749_v63 }
 0x1eb   :  { %v2522_v16 = vpop.eup %2521  ;;  %2547 = vrcp.f32 %v1392_v36  ;;  %v1615_v4 = vmul.f32 %v2520_v27, %v2518_v40  ;;  %1886 = vst.msk [vmem:[%s3511_s5 + $0x18] sm:$0xff] %vm1882_vm0, %v1847_v31  ;;  %v787_v10 = vpop.f32.mrf.mxu0  ;;  %v1021_v27 = vadd.f32 %v1020_v24, %v2743_v58 }
 0x1ec   :  { %v2524_v9 = vpop.eup %2523  ;;  %v1393_v11 = vadd.f32 1.0, %v2522_v16  ;;  %2549 = vtanh.f32 %v768_v33  ;;  %v1804_v15 = vadd.f32 %v1702_v14, %v1701_v26 }
 0x1ed   :  { %v2526_v61 = vpop.eup %2525  ;;  %2551 = vpow2.f32 %v2058_v45  ;;  %v1737_v30 = vpop.xlane.xlu0 %1736  ;;  %v1703_v62 = vmul.f32 %v2806_v39, %v1615_v4 }
 0x1ee   :  { %v2528_v17 = vpop.eup %2527  ;;  %2553 = vrcp.f32 %v1393_v11  ;;  %1805 = vadd.xlane.f32.xlu1 %v1804_v15  ;;  %v1616_v32 = vmul.f32 %v2526_v61, %v2524_v9  ;;  %v1848_v23 = vadd.f32 %v3234_v42, %v1737_v30  ;;  %v782_v9 = vadd.f32 %v3291_v51, %v2754_v3  ;;  %v1024_v11 = vpop.f32.mrf.mxu1 }
 0x1ef   :  { %v2530_v43 = vpop.eup %2529  ;;  %v1394_v2 = vadd.f32 1.0, %v2528_v17  ;;  %2555 = vtanh.f32 %v770_v53  ;;  %v1023_v53 = vadd.f32 %v1022_v48, %v2740_v56  ;;  %v2064_v30 = vmul.f32 -1.442695, %v1021_v27 }
 0x1f0   :  { %v2532_v37 = vpop.eup %2531  ;;  %2557 = vpow2.f32 %v2059_v34  ;;  %v1704_v28 = vmul.f32 %v2814_v44, %v1616_v32  ;;  %1887 = vst.msk [vmem:[%s3511_s5 + $0x20] sm:$0xff] %vm1882_vm0, %v1848_v23  ;;  %v789_v34 = vpop.f32.mrf.mxu0  ;;  %v1025_v23 = vadd.f32 %v1024_v11, %v2743_v58 }
 0x1f1   :  { %v2534_v60 = vpop.eup %2533  ;;  %2559 = vrcp.f32 %v1394_v2  ;;  %v1617_v20 = vmul.f32 %v2532_v37, %v2530_v43  ;;  %v2065_v32 = vmul.f32 -1.442695, %v1023_v53 }
 0x1f2   :  { %v2536_v57 = vpop.eup %2535  ;;  %v1395_v7 = vadd.f32 1.0, %v2534_v60  ;;  %2561 = vtanh.f32 %v772_v6  ;;  %v1807_v19 = vadd.f32 %v1704_v28, %v1703_v62  ;;  %v791_v43 = vpop.f32.mrf.mxu0  ;;  %v2066_v58 = vmul.f32 -1.442695, %v1025_v23 }
 0x1f3   :  { %v2538_v38 = vpop.eup %2537  ;;  %2563 = vpow2.f32 %v2060_v12  ;;  %v1705_v40 = vmul.f32 %v2806_v39, %v1617_v20 }
 0x1f4   :  { %v2540_v52 = vpop.eup %2539  ;;  %2565 = vrcp.f32 %v1395_v7  ;;  %1808 = vadd.xlane.f32.xlu0 %v1807_v19  ;;  %v1618_v18 = vmul.f32 %v2538_v38, %v2536_v57  ;;  %v1740_v8 = vpop.xlane.xlu1 %1739 }
 0x1f5   :  { %v2542_v59 = vpop.eup %2541  ;;  %v1396_v49 = vadd.f32 1.0, %v2540_v52  ;;  %2567 = vtanh.f32 %v776_v35  ;;  %v1849_v21 = vadd.f32 %v3234_v42, %v1740_v8  ;;  %v795_v24 = vpop.f32.mrf.mxu0  ;;  %v790_v52 = vadd.f32 %v789_v34, %v2749_v63 }
 0x1f6   :  { %v2544_v33 = vpop.eup %2543  ;;  %2569 = vpow2.f32 %v2061_v22  ;;  %v1706_v36 = vmul.f32 %v2814_v44, %v1618_v18  ;;  %v788_v22 = vadd.f32 %v787_v10, %v2754_v3 }
 0x1f7   :  { %v2546_v45 = vpop.eup %2545  ;;  %2571 = vrcp.f32 %v1396_v49  ;;  %1888 = vst.msk [vmem:[%s3511_s5 + $0x28] sm:$0xff] %vm1882_vm0, %v1849_v21  ;;  %v1619_v31 = vmul.f32 %v2544_v33, %v2542_v59  ;;  %v797_v10 = vpop.f32.mrf.mxu0 }
 0x1f8   :  { %v2548_v47 = vpop.eup %2547  ;;  %v1397_v26 = vadd.f32 1.0, %v2546_v45  ;;  %2573 = vtanh.f32 %v778_v1  ;;  %v1810_v14 = vadd.f32 %v1706_v36, %v1705_v40  ;;  %v792_v1 = vadd.f32 %v791_v43, %v2754_v3 }
 0x1f9   :  { %v2550_v16 = vpop.eup %2549  ;;  %2575 = vpow2.f32 %v2062_v5  ;;  %v1743_v41 = vpop.xlane.xlu0 %1742  ;;  %v1707_v56 = vmul.f32 %v2806_v39, %v1619_v31  ;;  %v798_v53 = vadd.f32 %v797_v10, %v2754_v3 }
 0x1fa   :  { %v2552_v25 = vpop.eup %2551  ;;  %2577 = vrcp.f32 %v1397_v26  ;;  %1811 = vadd.xlane.f32.xlu1 %v1810_v14  ;;  %v1620_v15 = vmul.f32 %v2550_v16, %v2548_v47  ;;  %v1850_v4 = vadd.f32 %v3234_v42, %v1743_v41  ;;  %v799_v14 = vpop.f32.mrf.mxu0 }
 0x1fb   :  { %v2554_v61 = vpop.eup %2553  ;;  %v1398_v54 = vadd.f32 1.0, %v2552_v25  ;;  %2579 = vtanh.f32 %v780_v0  ;;  %v796_v0 = vadd.f32 %v795_v24, %v2749_v63 }
 0x1fc   :  { %v2556_v17 = vpop.eup %2555  ;;  %2581 = vpow2.f32 %v2063_v13  ;;  %v1708_v6 = vmul.f32 %v2814_v44, %v1620_v15  ;;  %1889 = vst.msk [vmem:[%s3511_s5 + $0x30] sm:$0xff] %vm1882_vm0, %v1850_v4 }
 0x1fd   :  { %v2558_v51 = vpop.eup %2557  ;;  %2583 = vrcp.f32 %v1398_v54  ;;  %v1621_v62 = vmul.f32 %v2556_v17, %v2554_v61 }
 0x1fe   :  { %v2560_v2 = vpop.eup %2559  ;;  %v1399_v12 = vadd.f32 1.0, %v2558_v51  ;;  %2585 = vtanh.f32 %v782_v9  ;;  %v1813_v37 = vadd.f32 %v1708_v6, %v1707_v56 }
 0x1ff   :  { %v2562_v28 = vpop.eup %2561  ;;  %2587 = vpow2.f32 %v2064_v30  ;;  %v1746_v60 = vpop.xlane.xlu1 %1745  ;;  %v1709_v20 = vmul.f32 %v2806_v39, %v1621_v62 }
 0x200   :  { %v2564_v35 = vpop.eup %2563  ;;  %2589 = vrcp.f32 %v1399_v12  ;;  %1814 = vadd.xlane.f32.xlu0 %v1813_v37  ;;  %v1622_v50 = vmul.f32 %v2562_v28, %v2560_v2  ;;  %v1851_v46 = vadd.f32 %v3234_v42, %v1746_v60  ;;  %v801_v30 = vpop.f32.mrf.mxu0 }
 0x201   :  { %v2566_v57 = vpop.eup %2565  ;;  %v1400_v7 = vadd.f32 1.0, %v2564_v35  ;;  %2591 = vtanh.f32 %v786_v29  ;;  %v800_v29 = vadd.f32 %v799_v14, %v2749_v63  ;;  %v802_v43 = vadd.f32 %v801_v30, %v2754_v3 }
 0x202   :  { %v2568_v19 = vpop.eup %2567  ;;  %2593 = vpow2.f32 %v2065_v32  ;;  %v1710_v38 = vmul.f32 %v2814_v44, %v1622_v50  ;;  %1890 = vst.msk [vmem:[%s3511_s5 + $0x38] sm:$0xff] %vm1882_vm0, %v1851_v46 }
 0x203   :  { %v2570_v55 = vpop.eup %2569  ;;  %2595 = vrcp.f32 %v1400_v7  ;;  %v1623_v49 = vmul.f32 %v2568_v19, %v2566_v57 }
 0x204   :  { %v2572_v18 = vpop.eup %2571  ;;  %v1401_v8 = vadd.f32 1.0, %v2570_v55  ;;  %2597 = vtanh.f32 %v788_v22  ;;  %v1816_v59 = vadd.f32 %v1710_v38, %v1709_v20 }
 0x205   :  { %v2574_v5 = vpop.eup %2573  ;;  %2599 = vpow2.f32 %v2066_v58  ;;  %v1749_v21 = vpop.xlane.xlu0 %1748  ;;  %v1711_v27 = vmul.f32 %v2806_v39, %v1623_v49 }
 0x206   :  { %v2576_v33 = vpop.eup %2575  ;;  %2601 = vrcp.f32 %v1401_v8  ;;  %1817 = vadd.xlane.f32.xlu1 %v1816_v59  ;;  %v1624_v48 = vmul.f32 %v2574_v5, %v2572_v18  ;;  %v1852_v40 = vadd.f32 %v3234_v42, %v1749_v21 }
 0x207   :  { %v2578_v36 = vpop.eup %2577  ;;  %v1402_v45 = vadd.f32 1.0, %v2576_v33  ;;  %2603 = vtanh.f32 %v790_v52 }
 0x208   :  { %v2580_v13 = vpop.eup %2579  ;;  %2605 = vtanh.f32 %v792_v1  ;;  %v1712_v47 = vmul.f32 %v2814_v44, %v1624_v48  ;;  %1891 = vst.msk [vmem:[%s3511_s5 + $0x40] sm:$0xff] %vm1882_vm0, %v1852_v40 }
 0x209   :  { %v2582_v26 = vpop.eup %2581  ;;  %2607 = vrcp.f32 %v1402_v45  ;;  %v1625_v41 = vmul.f32 %v2580_v13, %v2578_v36 }
 0x20a   :  { %v2584_v31 = vpop.eup %2583  ;;  %v1403_v16 = vadd.f32 1.0, %v2582_v26  ;;  %v1819_v34 = vadd.f32 %v1712_v47, %v1711_v27  ;;  %2609 = vtanh.f32 %v796_v0 }
 0x20b   :  { %v2586_v25 = vpop.eup %2585  ;;  %v1752_v9 = vpop.xlane.xlu1 %1751  ;;  %v1713_v56 = vmul.f32 %v2806_v39, %v1625_v41 }
 0x20c   :  { %v2588_v11 = vpop.eup %2587  ;;  %2611 = vrcp.f32 %v1403_v16  ;;  %1820 = vadd.xlane.f32.xlu0 %v1819_v34  ;;  %v1626_v15 = vmul.f32 %v2586_v25, %v2584_v31  ;;  %v1853_v4 = vadd.f32 %v3234_v42, %v1752_v9 }
 0x20d   :  { %v2590_v61 = vpop.eup %2589  ;;  %v1404_v54 = vadd.f32 1.0, %v2588_v11  ;;  %2613 = vtanh.f32 %v798_v53 }
 0x20e   :  { %v2592_v17 = vpop.eup %2591  ;;  %v1714_v6 = vmul.f32 %v2814_v44, %v1626_v15  ;;  %1892 = vst.msk [vmem:[%s3511_s5 + $0x48] sm:$0xff] %vm1882_vm0, %v1853_v4 }
 0x20f   :  { %v2594_v51 = vpop.eup %2593  ;;  %2615 = vrcp.f32 %v1404_v54  ;;  %v1627_v12 = vmul.f32 %v2592_v17, %v2590_v61 }
 0x210   :  { %v2596_v32 = vpop.eup %2595  ;;  %v1405_v23 = vadd.f32 1.0, %v2594_v51  ;;  %v1822_v2 = vadd.f32 %v1714_v6, %v1713_v56 }
 0x211   :  { %v2598_v37 = vpop.eup %2597  ;;  %v1755_v62 = vpop.xlane.xlu0 %1754  ;;  %v1715_v63 = vmul.f32 %v2806_v39, %v1627_v12 }
 0x212   :  { %v2600_v28 = vpop.eup %2599  ;;  %2617 = vrcp.f32 %v1405_v23  ;;  %1823 = vadd.xlane.f32.xlu1 %v1822_v2  ;;  %v1628_v60 = vmul.f32 %v2598_v37, %v2596_v32  ;;  %v1854_v35 = vadd.f32 %v3234_v42, %v1755_v62 }
 0x213   :  { %v2602_v22 = vpop.eup %2601  ;;  %v1406_v50 = vadd.f32 1.0, %v2600_v28  ;;  %2619 = vtanh.f32 %v800_v29 }
 0x214   :  { %v2604_v46 = vpop.eup %2603  ;;  %2621 = vtanh.f32 %v802_v43  ;;  %v1716_v57 = vmul.f32 %v2814_v44, %v1628_v60  ;;  %1893 = vst.msk [vmem:[%s3511_s5 + $0x50] sm:$0xff] %vm1882_vm0, %v1854_v35 }
 0x215   :  { %v2606_v3 = vpop.eup %2605  ;;  %2623 = vrcp.f32 %v1406_v50  ;;  %v1629_v7 = vmul.f32 %v2604_v46, %v2602_v22 }
 0x216   :  { %v2608_v58 = vpop.eup %2607  ;;  %v1825_v24 = vadd.f32 %v1716_v57, %v1715_v63 }
 0x217   :  { %v1630_v19 = vmul.f32 %v2608_v58, %v2606_v3  ;;  %v1758_v20 = vpop.xlane.xlu1 %1757  ;;  %v2610_v38 = vpop.eup %2609  ;;  %v1717_v1 = vmul.f32 %v2806_v39, %v1629_v7 }
 0x218   :  { %1826 = vadd.xlane.f32.xlu0 %v1825_v24  ;;  %v1855_v55 = vadd.f32 %v3234_v42, %v1758_v20 }
 0x219   :  { %v2612_v52 = vpop.eup %2611  ;;  %v1718_v18 = vmul.f32 %v2814_v44, %v1630_v19 }
 0x21a   :  { %1894 = vst.msk [vmem:[%s3511_s5 + $0x58] sm:$0xff] %vm1882_vm0, %v1855_v55  ;;  %v2614_v8 = vpop.eup %2613  ;;  %v1631_v49 = vmul.f32 %v2612_v52, %v2610_v38 }
 0x21b   :  { %v1828_v59 = vadd.f32 %v1718_v18, %v1717_v1 }
 0x21c   :  { %v2616_v5 = vpop.eup %2615  ;;  %v1719_v40 = vmul.f32 %v2806_v39, %v1631_v49 }
 0x21d   :  { %1829 = vadd.xlane.f32.xlu1 %v1828_v59  ;;  %v1632_v10 = vmul.f32 %v2616_v5, %v2614_v8  ;;  %v1761_v21 = vpop.xlane.xlu0 %1760 }
 0x21e   :  { %v1856_v33 = vadd.f32 %v3234_v42, %v1761_v21 }
 0x21f   :  { %v2618_v48 = vpop.eup %2617  ;;  %v1720_v36 = vmul.f32 %v2814_v44, %v1632_v10 }
 0x220   :  { %v2620_v45 = vpop.eup %2619  ;;  %1895 = vst.msk [vmem:[%s3511_s5 + $0x60] sm:$0xff] %vm1882_vm0, %v1856_v33 }
 0x221   :  { %v2622_v0 = vpop.eup %2621  ;;  %v1831_v13 = vadd.f32 %v1720_v36, %v1719_v40  ;;  %v1633_v27 = vmul.f32 %v2620_v45, %v2618_v48 }
 0x222   :  { %v2624_v47 = vpop.eup %2623 }
 0x223   :  { %1832 = vadd.xlane.f32.xlu0 %v1831_v13  ;;  %v1634_v26 = vmul.f32 %v2624_v47, %v2622_v0  ;;  %v1764_v14 = vpop.xlane.xlu1 %1763  ;;  %v1721_v16 = vmul.f32 %v2806_v39, %v1633_v27 }
 0x224   :  { %v1857_v31 = vadd.f32 %v3234_v42, %v1764_v14 }
 0x225   :  { %v1722_v53 = vmul.f32 %v2814_v44, %v1634_v26 }
 0x226   :  { %1896 = vst.msk [vmem:[%s3511_s5 + $0x68] sm:$0xff] %vm1882_vm0, %v1857_v31 }
 0x227   :  { %v1834_v34 = vadd.f32 %v1722_v53, %v1721_v16 }
 0x229   :  { %1835 = vadd.xlane.f32.xlu1 %v1834_v34  ;;  %v1767_v41 = vpop.xlane.xlu0 %1766 }
 0x22a   :  { %v1858_v25 = vadd.f32 %v3234_v42, %v1767_v41 }
 0x22c   :  { %1897 = vst.msk [vmem:[%s3511_s5 + $0x70] sm:$0xff] %vm1882_vm0, %v1858_v25 }
 0x22f   :  { %v1770_v9 = vpop.xlane.xlu1 %1769 }
 0x230   :  { %v1859_v39 = vadd.f32 %v3234_v42, %v1770_v9 }
 0x232   :  { %1898 = vst.msk [vmem:[%s3511_s5 + $0x78] sm:$0xff] %vm1882_vm0, %v1859_v39 }
 0x235   :  { %v1773_v44 = vpop.xlane.xlu0 %1772 }
 0x236   :  { %v1860_v11 = vadd.f32 %v3234_v42, %v1773_v44 }
 0x238   :  { %1899 = vst.msk [vmem:[%s3511_s5 + $0x80] sm:$0xff] %vm1882_vm0, %v1860_v11 }
 0x23b   :  { %v1776_v15 = vpop.xlane.xlu1 %1775 }
 0x23c   :  { %v1861_v4 = vadd.f32 %v3234_v42, %v1776_v15 }
 0x23e   :  { %1900 = vst.msk [vmem:[%s3511_s5 + $0x88] sm:$0xff] %vm1882_vm0, %v1861_v4 }
 0x241   :  { %v1779_v61 = vpop.xlane.xlu0 %1778 }
 0x242   :  { %v1862_v54 = vadd.f32 %v3234_v42, %v1779_v61 }
 0x244   :  { %1901 = vst.msk [vmem:[%s3511_s5 + $0x90] sm:$0xff] %vm1882_vm0, %v1862_v54 }
 0x247   :  { %v1782_v30 = vpop.xlane.xlu1 %1781 }
 0x248   :  { %v1863_v17 = vadd.f32 %v3234_v42, %v1782_v30 }
 0x24a   :  { %1902 = vst.msk [vmem:[%s3511_s5 + $0x98] sm:$0xff] %vm1882_vm0, %v1863_v17 }
 0x24d   :  { %v1785_v56 = vpop.xlane.xlu0 %1784 }
 0x24e   :  { %v1864_v6 = vadd.f32 %v3234_v42, %v1785_v56 }
 0x250   :  { %1903 = vst.msk [vmem:[%s3511_s5 + $0xa0] sm:$0xff] %vm1882_vm0, %v1864_v6 }
 0x253   :  { %v1788_v51 = vpop.xlane.xlu1 %1787 }
 0x254   :  { %v1865_v29 = vadd.f32 %v3234_v42, %v1788_v51 }
 0x256   :  { %1904 = vst.msk [vmem:[%s3511_s5 + $0xa8] sm:$0xff] %vm1882_vm0, %v1865_v29 }
 0x259   :  { %v1791_v32 = vpop.xlane.xlu0 %1790 }
 0x25a   :  { %v1866_v23 = vadd.f32 %v3234_v42, %v1791_v32 }
 0x25c   :  { %1905 = vst.msk [vmem:[%s3511_s5 + $0xb0] sm:$0xff] %vm1882_vm0, %v1866_v23 }
 0x25f   :  { %v1794_v43 = vpop.xlane.xlu1 %1793 }
 0x260   :  { %v1867_v2 = vadd.f32 %v3234_v42, %v1794_v43 }
 0x262   :  { %1906 = vst.msk [vmem:[%s3511_s5 + $0xb8] sm:$0xff] %vm1882_vm0, %v1867_v2 }
 0x265   :  { %v1797_v12 = vpop.xlane.xlu0 %1796 }
 0x266   :  { %v1868_v37 = vadd.f32 %v3234_v42, %v1797_v12 }
 0x268   :  { %1907 = vst.msk [vmem:[%s3511_s5 + $0xc0] sm:$0xff] %vm1882_vm0, %v1868_v37 }
 0x26b   :  { %v1800_v62 = vpop.xlane.xlu1 %1799 }
 0x26c   :  { %v1869_v28 = vadd.f32 %v3234_v42, %v1800_v62 }
 0x26e   :  { %1908 = vst.msk [vmem:[%s3511_s5 + $0xc8] sm:$0xff] %vm1882_vm0, %v1869_v28 }
 0x271   :  { %v1803_v60 = vpop.xlane.xlu0 %1802 }
 0x272   :  { %v1870_v35 = vadd.f32 %v3234_v42, %v1803_v60 }
 0x274   :  { %1909 = vst.msk [vmem:[%s3511_s5 + $0xd0] sm:$0xff] %vm1882_vm0, %v1870_v35 }
 0x277   :  { %v1806_v22 = vpop.xlane.xlu1 %1805 }
 0x278   :  { %v1871_v50 = vadd.f32 %v3234_v42, %v1806_v22 }
 0x27a   :  { %1910 = vst.msk [vmem:[%s3511_s5 + $0xd8] sm:$0xff] %vm1882_vm0, %v1871_v50 }
 0x27d   :  { %v1809_v46 = vpop.xlane.xlu0 %1808 }
 0x27e   :  { %v1872_v63 = vadd.f32 %v3234_v42, %v1809_v46 }
 0x280   :  { %1911 = vst.msk [vmem:[%s3511_s5 + $0xe0] sm:$0xff] %vm1882_vm0, %v1872_v63 }
 0x283   :  { %v1812_v57 = vpop.xlane.xlu1 %1811 }
 0x284   :  { %v1873_v3 = vadd.f32 %v3234_v42, %v1812_v57 }
 0x286   :  { %1912 = vst.msk [vmem:[%s3511_s5 + $0xe8] sm:$0xff] %vm1882_vm0, %v1873_v3 }
 0x289   :  { %v1815_v7 = vpop.xlane.xlu0 %1814 }
 0x28a   :  { %v1874_v58 = vadd.f32 %v3234_v42, %v1815_v7 }
 0x28c   :  { %1913 = vst.msk [vmem:[%s3511_s5 + $0xf0] sm:$0xff] %vm1882_vm0, %v1874_v58 }
 0x28f   :  { %v1818_v24 = vpop.xlane.xlu1 %1817 }
 0x290   :  { %v1875_v19 = vadd.f32 %v3234_v42, %v1818_v24 }
 0x292   :  { %1914 = vst.msk [vmem:[%s3511_s5 + $0xf8] sm:$0xff] %vm1882_vm0, %v1875_v19 }
 0x295   :  { %v1821_v20 = vpop.xlane.xlu0 %1820 }
 0x296   :  { %v1876_v38 = vadd.f32 %v3234_v42, %v1821_v20 }
 0x298   :  { %1915 = vst.msk [vmem:[%s3511_s5 + $0x100] sm:$0xff] %vm1882_vm0, %v1876_v38 }
 0x29b   :  { %v1824_v55 = vpop.xlane.xlu1 %1823 }
 0x29c   :  { %v1877_v52 = vadd.f32 %v3234_v42, %v1824_v55 }
 0x29e   :  { %1916 = vst.msk [vmem:[%s3511_s5 + $0x108] sm:$0xff] %vm1882_vm0, %v1877_v52 }
 0x2a1   :  { %v1827_v1 = vpop.xlane.xlu0 %1826 }
 0x2a2   :  { %v1878_v18 = vadd.f32 %v3234_v42, %v1827_v1 }
 0x2a4   :  { %1917 = vst.msk [vmem:[%s3511_s5 + $0x110] sm:$0xff] %vm1882_vm0, %v1878_v18 }
 0x2a6   :  { %v1830_v8 = vpop.xlane.xlu1 %1829 }
 0x2a7   :  { %v1879_v59 = vadd.f32 %v3234_v42, %v1830_v8 }
 0x2a9   :  { %1918 = vst.msk [vmem:[%s3511_s5 + $0x118] sm:$0xff] %vm1882_vm0, %v1879_v59 }
 0x2ac   :  { %v1833_v49 = vpop.xlane.xlu0 %1832 }
 0x2ad   :  { %v1880_v5 = vadd.f32 %v3234_v42, %v1833_v49 }
 0x2af   :  { %1919 = vst.msk [vmem:[%s3511_s5 + $0x120] sm:$0xff] %vm1882_vm0, %v1880_v5 }
 0x2b2   :  { %v1836_v10 = vpop.xlane.xlu1 %1835 }
 0x2b3   :  { %v1881_v21 = vadd.f32 %v3234_v42, %v1836_v10 }
 0x2b5   :  { %1920 = vst.msk [vmem:[%s3511_s5 + $0x128] sm:$0xff] %vm1882_vm0, %v1881_v21 }
 0x2b6   :  { %1925 = vsyncpa [#allocation4], 1 }
 0x2b7   :  { %1926 = vsyncpa [#allocation6], 1 }

</bundles_post_ra>
